<compile_context>
chip_gen: v6e
topology: v6e:2x2x1
jax: 0.10.0
libtpu: 0.0.40
codegen_flags: <defaults>
</compile_context>

<pallas_src>
import jax
import jax.numpy as jnp
from jax.experimental import pallas as pl
from jax.experimental.pallas import tpu as pltpu
from functools import partial


# ---- lane-aligned padded sizes -------------------------------------------------
K_PAD = 128     # 9 * Cin (= 27 for RGB) padded to a full lane group
COUT_PAD = 128  # stem channels (stem_multiplier*C = 12) padded to a full lane group
NC_PAD = 128    # num_classes (10) padded to a full lane group
BT = 8          # images per grid step (one image per sublane row of the output tile)


# ---------------------------------------------------------------------------
# Fused kernel: one grid step = BT images.
#   xcol_ref : [BT*H*W, K_PAD]   bf16 im2col patches (tap-major (dy,dx,ci), zero pad)
#   w_ref    : [K_PAD, COUT_PAD] bf16 conv weights (zero in pad)
#   fcw_ref  : [COUT_PAD, NC_PAD] f32  (scale * fc_w.T) / (H*W)   (zero in pad)
#   fcb_ref  : [1, NC_PAD]        f32  fc_b + shift @ fc_w.T      (zero in pad)
#   o_ref    : [BT, NC_PAD]       f32  logits, one image per sublane row
#   pooled_ref: VMEM scratch [BT, COUT_PAD] f32 pooled features (pre-BN, pre-/HW)
# ---------------------------------------------------------------------------
def fused_stem_head_kernel(xcol_ref, w_ref, fcw_ref, fcb_ref, o_ref, pooled_ref, *, HW):
    wmat = w_ref[...]                                           # [K_PAD, COUT_PAD] bf16

    # conv3x3 per image as a single lane-dense matmul; pool it in registers.
    for b in range(BT):                                         # static unroll (BT=8)
        patches = xcol_ref[pl.ds(b * HW, HW), :]                # [HW, K_PAD] bf16
        conv_b = jnp.dot(patches, wmat,
                         preferred_element_type=jnp.float32)    # [HW, COUT_PAD] f32
        pooled_ref[pl.ds(b, 1), :] = jnp.sum(conv_b, axis=0, keepdims=True)

    # Classifier (BN affine and 1/(H*W) folded into fcw/fcb). Full (8,128) store.
    o_ref[...] = (jnp.dot(pooled_ref[...], fcw_ref[...],
                          preferred_element_type=jnp.float32) + fcb_ref[...])


@partial(jax.jit, static_argnames=("num_classes",))
def network_forward(x_nchw, params, num_classes):
    """Forward pass. x_nchw: [B, 3, H, W] float32 -> logits [B, num_classes]."""
    B, Cin, H, W = x_nchw.shape
    HW = H * W
    assert 9 * Cin <= K_PAD

    # ---- batch pad to a multiple of BT (padded images are zeros, sliced off) ----
    Bpad = ((B + BT - 1) // BT) * BT
    n_steps = Bpad // BT

    # ---- wrapper-side im2col to a lane-dense [Bpad*H*W, K_PAD] bf16 operand -----
    x_nhwc = jnp.transpose(x_nchw, (0, 2, 3, 1))                    # [B,H,W,Cin]
    xp = jnp.pad(x_nhwc, ((0, Bpad - B), (1, 1), (1, 1), (0, 0)))   # batch + halo pad
    taps = [xp[:, dy:dy + H, dx:dx + W, :] for dy in range(3) for dx in range(3)]
    xcol = jnp.concatenate(taps, axis=-1).reshape(Bpad * HW, 9 * Cin)
    xcol = jnp.pad(xcol, ((0, 0), (0, K_PAD - 9 * Cin))).astype(jnp.bfloat16)

    # ---- stem_01 conv weights: [Cout,Cin,3,3] -> tap-major [9*Cin, Cout], bf16 ---
    w_conv = params["conv_w"]
    Cout = w_conv.shape[0]
    assert Cout <= COUT_PAD and num_classes <= NC_PAD
    w_mat = jnp.transpose(w_conv, (2, 3, 1, 0)).reshape(9 * Cin, Cout)
    w_mat = jnp.pad(w_mat, ((0, K_PAD - 9 * Cin), (0, COUT_PAD - Cout)))
    w_mat = w_mat.astype(jnp.bfloat16)

    # ---- fold BN affine + 1/(H*W) of AdaptiveAvgPool2d(1) into the FC (exact:
    #      no nonlinearity between BN and the pool) --------------------------------
    eps = 1e-5
    scale = params["bn_gamma"] / jnp.sqrt(params["bn_var"] + eps)     # [Cout]
    shift = params["bn_beta"] - params["bn_mean"] * scale             # [Cout]
    fc_w = params["fc_w"]                                             # [NC, Cout]
    fcw_fold = (scale[:, None] * fc_w.T) / float(HW)                  # [Cout, NC]
    fcb_fold = params["fc_b"] + shift @ fc_w.T                        # [NC]
    fcw_fold = jnp.pad(fcw_fold, ((0, COUT_PAD - Cout), (0, NC_PAD - num_classes)))
    fcb_fold = jnp.pad(fcb_fold, (0, NC_PAD - num_classes)).reshape(1, NC_PAD)

    # TODO(synk): the `layers` StemCell search cells (TopoStruc / StemCell / alphas)
    # are not defined in the provided source and are therefore not implemented;
    # s1 = stem_01(input) feeds the pooling + classifier head directly.

    kernel = partial(fused_stem_head_kernel, HW=HW)

    flops = Bpad * (2 * HW * K_PAD * COUT_PAD     # conv matmul
                    + HW * COUT_PAD               # pool reduce
                    + 2 * COUT_PAD * NC_PAD)      # FC
    bytes_accessed = (2 * (xcol.size + w_mat.size)
                      + 4 * (fcw_fold.size + fcb_fold.size + Bpad * NC_PAD))

    out = pl.pallas_call(
        kernel,
        out_shape=jax.ShapeDtypeStruct((Bpad, NC_PAD), jnp.float32),
        grid=(n_steps,),
        in_specs=[
            pl.BlockSpec((BT * HW, K_PAD), lambda b: (b, 0)),
            pl.BlockSpec((K_PAD, COUT_PAD), lambda b: (0, 0)),
            pl.BlockSpec((COUT_PAD, NC_PAD), lambda b: (0, 0)),
            pl.BlockSpec((1, NC_PAD), lambda b: (0, 0)),
        ],
        out_specs=pl.BlockSpec((BT, NC_PAD), lambda b: (b, 0)),
        scratch_shapes=[pltpu.VMEM((BT, COUT_PAD), jnp.float32)],
        compiler_params=pltpu.CompilerParams(
            dimension_semantics=("parallel",),       # shard batch steps across TCs (v7x)
            vmem_limit_bytes=32 * 1024 * 1024,
        ),
        cost_estimate=pl.CostEstimate(flops=flops, transcendentals=0,
                                      bytes_accessed=bytes_accessed),
    )(xcol, w_mat, fcw_fold, fcb_fold)

    # slice off batch padding / lane padding
    return out[:B, :num_classes]


def init_params(key, C=4, stem_multiplier=3, num_classes=10):
    """Deterministic synthetic parameter init (shapes follow the module __init__).

    BatchNorm running stats / affine are randomized (instead of the PyTorch default
    gamma=1, beta=0, mean=0, var=1) so the BN->FC fold is actually exercised.
    """
    C_stem = stem_multiplier * C
    k_conv, k_fc_w, k_fc_b, k_g, k_b, k_m, k_v = jax.random.split(key, 7)
    params = {
        # stem_01: Conv2d(3, stem_multiplier*C, 3, padding=1, bias=False)
        "conv_w": 0.1 * jax.random.normal(k_conv, (C_stem, 3, 3, 3), jnp.float32),
        # BatchNorm2d(C_stem) — inference mode with (randomized) running stats
        "bn_gamma": 1.0 + 0.1 * jax.random.normal(k_g, (C_stem,), jnp.float32),
        "bn_beta": 0.1 * jax.random.normal(k_b, (C_stem,), jnp.float32),
        "bn_mean": 0.1 * jax.random.normal(k_m, (C_stem,), jnp.float32),
        "bn_var": 1.0 + 0.5 * jax.random.uniform(k_v, (C_stem,), jnp.float32),
        # classifier: Linear(C_prev, num_classes)
        "fc_w": 0.1 * jax.random.normal(k_fc_w, (num_classes, C_stem), jnp.float32),
        "fc_b": 0.01 * jax.random.normal(k_fc_b, (num_classes,), jnp.float32),
    }
    return params


def _reference_forward(x_nchw, params, num_classes):
    """Pure-JAX reference (conv inputs bf16-quantized to match the kernel)."""
    eps = 1e-5
    xq = x_nchw.astype(jnp.bfloat16).astype(jnp.float32)
    wq = params["conv_w"].astype(jnp.bfloat16).astype(jnp.float32)
    y = jax.lax.conv_general_dilated(
        xq, wq, window_strides=(1, 1), padding="SAME",
        dimension_numbers=("NCHW", "OIHW", "NCHW"),
        precision=jax.lax.Precision.HIGHEST,
    )
    scale = (params["bn_gamma"] / jnp.sqrt(params["bn_var"] + eps)).reshape(1, -1, 1, 1)
    shift = (params["bn_beta"] - params["bn_mean"] * params["bn_gamma"]
             / jnp.sqrt(params["bn_var"] + eps)).reshape(1, -1, 1, 1)
    y = y * scale + shift
    pooled = jnp.mean(y, axis=(2, 3))                       # [B, C]
    return pooled @ params["fc_w"].T + params["fc_b"]       # [B, num_classes]


if __name__ == "__main__":
    key = jax.random.PRNGKey(0)
    k_x, k_p = jax.random.split(key)

    # input must have 3 channels (stem conv is 3 -> stem_multiplier*C)
    B, Cin, H, W = 16, 3, 16, 16          # B=16 -> grid of 2 steps of BT=8 images
    C, num_classes = 4, 10

    x = jax.random.normal(k_x, (B, Cin, H, W), jnp.float32)
    params = init_params(k_p, C=C, stem_multiplier=3, num_classes=num_classes)

    logits = network_forward(x, params, num_classes)
    logits = jax.block_until_ready(logits)

    ref = _reference_forward(x, params, num_classes)
    assert logits.shape == (B, num_classes)
    assert jnp.allclose(logits, ref, atol=5e-4, rtol=5e-4), "mismatch vs JAX reference"

    print("KERNEL_OK")
</pallas_src>

<mosaic_0001>
module attributes {stable_mosaic.version = 11 : i64} {
  func.func @fused_stem_head_kernel(%arg0: i32, %arg1: memref<2048x128xbf16, #tpu.memory_space<vmem>>, %arg2: memref<128x128xbf16, #tpu.memory_space<vmem>>, %arg3: memref<128x128xf32, #tpu.memory_space<vmem>>, %arg4: memref<1x128xf32, #tpu.memory_space<vmem>>, %arg5: memref<8x128xf32, #tpu.memory_space<vmem>>, %arg6: memref<8x128xf32, #tpu.memory_space<vmem>>) attributes {dimension_semantics = [#tpu.dimension_semantics<parallel>], iteration_bounds = array<i64: 2>, scalar_prefetch = 0 : i64, scratch_operands = 1 : i64, tpu.core_type = #tpu.core_type<tc>, window_params = [{transform_indices = @transform_0, window_bounds = array<i64: 2048, 128>}, {pipeline_mode = #tpu.pipeline_mode<synchronous>, transform_indices = @transform_1, window_bounds = array<i64: 128, 128>}, {pipeline_mode = #tpu.pipeline_mode<synchronous>, transform_indices = @transform_2, window_bounds = array<i64: 128, 128>}, {pipeline_mode = #tpu.pipeline_mode<synchronous>, transform_indices = @transform_3, window_bounds = array<i64: 1, 128>}, {transform_indices = @transform_4, window_bounds = array<i64: 8, 128>}]} {
    %c0 = arith.constant 0 : index
    %c0_0 = arith.constant 0 : index
    %0 = vector.load %arg2[%c0, %c0_0] : memref<128x128xbf16, #tpu.memory_space<vmem>>, vector<128x128xbf16>
    %c0_1 = arith.constant 0 : index
    %c0_2 = arith.constant 0 : index
    %1 = vector.load %arg1[%c0_1, %c0_2] : memref<2048x128xbf16, #tpu.memory_space<vmem>>, vector<256x128xbf16>
    %cst = arith.constant dense<0.000000e+00> : vector<256x128xf32>
    %2 = tpu.matmul %1, %0, %cst {dimension_numbers = #tpu.dot_dimension_numbers<[1], [0], [0], [1], [0, 0, 1, 1], [], []>} : vector<256x128xbf16>, vector<128x128xbf16>, vector<256x128xf32> -> vector<256x128xf32>
    %cst_3 = arith.constant dense<0.000000e+00> : vector<128xf32>
    %3 = vector.multi_reduction <add>, %2, %cst_3 [0] : vector<256x128xf32> to vector<128xf32>
    %4 = vector.shape_cast %3 : vector<128xf32> to vector<1x128xf32>
    %c0_4 = arith.constant 0 : index
    %c0_5 = arith.constant 0 : index
    %5 = vector.load %arg6[%c0_4, %c0_5] : memref<8x128xf32, #tpu.memory_space<vmem>>, vector<1x128xf32>
    tpu.vector_store %arg6[%c0_4, %c0_5], %4 {strides = array<i32>} : memref<8x128xf32, #tpu.memory_space<vmem>>, vector<1x128xf32>,
    %c256 = arith.constant 256 : index
    %c0_6 = arith.constant 0 : index
    %6 = vector.load %arg1[%c256, %c0_6] : memref<2048x128xbf16, #tpu.memory_space<vmem>>, vector<256x128xbf16>
    %cst_7 = arith.constant dense<0.000000e+00> : vector<256x128xf32>
    %7 = tpu.matmul %6, %0, %cst_7 {dimension_numbers = #tpu.dot_dimension_numbers<[1], [0], [0], [1], [0, 0, 1, 1], [], []>} : vector<256x128xbf16>, vector<128x128xbf16>, vector<256x128xf32> -> vector<256x128xf32>
    %cst_8 = arith.constant dense<0.000000e+00> : vector<128xf32>
    %8 = vector.multi_reduction <add>, %7, %cst_8 [0] : vector<256x128xf32> to vector<128xf32>
    %9 = vector.shape_cast %8 : vector<128xf32> to vector<1x128xf32>
    %c1 = arith.constant 1 : index
    %c0_9 = arith.constant 0 : index
    %10 = vector.load %arg6[%c1, %c0_9] : memref<8x128xf32, #tpu.memory_space<vmem>>, vector<1x128xf32>
    tpu.vector_store %arg6[%c1, %c0_9], %9 {strides = array<i32>} : memref<8x128xf32, #tpu.memory_space<vmem>>, vector<1x128xf32>,
    %c512 = arith.constant 512 : index
    %c0_10 = arith.constant 0 : index
    %11 = vector.load %arg1[%c512, %c0_10] : memref<2048x128xbf16, #tpu.memory_space<vmem>>, vector<256x128xbf16>
    %cst_11 = arith.constant dense<0.000000e+00> : vector<256x128xf32>
    %12 = tpu.matmul %11, %0, %cst_11 {dimension_numbers = #tpu.dot_dimension_numbers<[1], [0], [0], [1], [0, 0, 1, 1], [], []>} : vector<256x128xbf16>, vector<128x128xbf16>, vector<256x128xf32> -> vector<256x128xf32>
    %cst_12 = arith.constant dense<0.000000e+00> : vector<128xf32>
    %13 = vector.multi_reduction <add>, %12, %cst_12 [0] : vector<256x128xf32> to vector<128xf32>
    %14 = vector.shape_cast %13 : vector<128xf32> to vector<1x128xf32>
    %c2 = arith.constant 2 : index
    %c0_13 = arith.constant 0 : index
    %15 = vector.load %arg6[%c2, %c0_13] : memref<8x128xf32, #tpu.memory_space<vmem>>, vector<1x128xf32>
    tpu.vector_store %arg6[%c2, %c0_13], %14 {strides = array<i32>} : memref<8x128xf32, #tpu.memory_space<vmem>>, vector<1x128xf32>,
    %c768 = arith.constant 768 : index
    %c0_14 = arith.constant 0 : index
    %16 = vector.load %arg1[%c768, %c0_14] : memref<2048x128xbf16, #tpu.memory_space<vmem>>, vector<256x128xbf16>
    %cst_15 = arith.constant dense<0.000000e+00> : vector<256x128xf32>
    %17 = tpu.matmul %16, %0, %cst_15 {dimension_numbers = #tpu.dot_dimension_numbers<[1], [0], [0], [1], [0, 0, 1, 1], [], []>} : vector<256x128xbf16>, vector<128x128xbf16>, vector<256x128xf32> -> vector<256x128xf32>
    %cst_16 = arith.constant dense<0.000000e+00> : vector<128xf32>
    %18 = vector.multi_reduction <add>, %17, %cst_16 [0] : vector<256x128xf32> to vector<128xf32>
    %19 = vector.shape_cast %18 : vector<128xf32> to vector<1x128xf32>
    %c3 = arith.constant 3 : index
    %c0_17 = arith.constant 0 : index
    %20 = vector.load %arg6[%c3, %c0_17] : memref<8x128xf32, #tpu.memory_space<vmem>>, vector<1x128xf32>
    tpu.vector_store %arg6[%c3, %c0_17], %19 {strides = array<i32>} : memref<8x128xf32, #tpu.memory_space<vmem>>, vector<1x128xf32>,
    %c1024 = arith.constant 1024 : index
    %c0_18 = arith.constant 0 : index
    %21 = vector.load %arg1[%c1024, %c0_18] : memref<2048x128xbf16, #tpu.memory_space<vmem>>, vector<256x128xbf16>
    %cst_19 = arith.constant dense<0.000000e+00> : vector<256x128xf32>
    %22 = tpu.matmul %21, %0, %cst_19 {dimension_numbers = #tpu.dot_dimension_numbers<[1], [0], [0], [1], [0, 0, 1, 1], [], []>} : vector<256x128xbf16>, vector<128x128xbf16>, vector<256x128xf32> -> vector<256x128xf32>
    %cst_20 = arith.constant dense<0.000000e+00> : vector<128xf32>
    %23 = vector.multi_reduction <add>, %22, %cst_20 [0] : vector<256x128xf32> to vector<128xf32>
    %24 = vector.shape_cast %23 : vector<128xf32> to vector<1x128xf32>
    %c4 = arith.constant 4 : index
    %c0_21 = arith.constant 0 : index
    %25 = vector.load %arg6[%c4, %c0_21] : memref<8x128xf32, #tpu.memory_space<vmem>>, vector<1x128xf32>
    tpu.vector_store %arg6[%c4, %c0_21], %24 {strides = array<i32>} : memref<8x128xf32, #tpu.memory_space<vmem>>, vector<1x128xf32>,
    %c1280 = arith.constant 1280 : index
    %c0_22 = arith.constant 0 : index
    %26 = vector.load %arg1[%c1280, %c0_22] : memref<2048x128xbf16, #tpu.memory_space<vmem>>, vector<256x128xbf16>
    %cst_23 = arith.constant dense<0.000000e+00> : vector<256x128xf32>
    %27 = tpu.matmul %26, %0, %cst_23 {dimension_numbers = #tpu.dot_dimension_numbers<[1], [0], [0], [1], [0, 0, 1, 1], [], []>} : vector<256x128xbf16>, vector<128x128xbf16>, vector<256x128xf32> -> vector<256x128xf32>
    %cst_24 = arith.constant dense<0.000000e+00> : vector<128xf32>
    %28 = vector.multi_reduction <add>, %27, %cst_24 [0] : vector<256x128xf32> to vector<128xf32>
    %29 = vector.shape_cast %28 : vector<128xf32> to vector<1x128xf32>
    %c5 = arith.constant 5 : index
    %c0_25 = arith.constant 0 : index
    %30 = vector.load %arg6[%c5, %c0_25] : memref<8x128xf32, #tpu.memory_space<vmem>>, vector<1x128xf32>
    tpu.vector_store %arg6[%c5, %c0_25], %29 {strides = array<i32>} : memref<8x128xf32, #tpu.memory_space<vmem>>, vector<1x128xf32>,
    %c1536 = arith.constant 1536 : index
    %c0_26 = arith.constant 0 : index
    %31 = vector.load %arg1[%c1536, %c0_26] : memref<2048x128xbf16, #tpu.memory_space<vmem>>, vector<256x128xbf16>
    %cst_27 = arith.constant dense<0.000000e+00> : vector<256x128xf32>
    %32 = tpu.matmul %31, %0, %cst_27 {dimension_numbers = #tpu.dot_dimension_numbers<[1], [0], [0], [1], [0, 0, 1, 1], [], []>} : vector<256x128xbf16>, vector<128x128xbf16>, vector<256x128xf32> -> vector<256x128xf32>
    %cst_28 = arith.constant dense<0.000000e+00> : vector<128xf32>
    %33 = vector.multi_reduction <add>, %32, %cst_28 [0] : vector<256x128xf32> to vector<128xf32>
    %34 = vector.shape_cast %33 : vector<128xf32> to vector<1x128xf32>
    %c6 = arith.constant 6 : index
    %c0_29 = arith.constant 0 : index
    %35 = vector.load %arg6[%c6, %c0_29] : memref<8x128xf32, #tpu.memory_space<vmem>>, vector<1x128xf32>
    tpu.vector_store %arg6[%c6, %c0_29], %34 {strides = array<i32>} : memref<8x128xf32, #tpu.memory_space<vmem>>, vector<1x128xf32>,
    %c1792 = arith.constant 1792 : index
    %c0_30 = arith.constant 0 : index
    %36 = vector.load %arg1[%c1792, %c0_30] : memref<2048x128xbf16, #tpu.memory_space<vmem>>, vector<256x128xbf16>
    %cst_31 = arith.constant dense<0.000000e+00> : vector<256x128xf32>
    %37 = tpu.matmul %36, %0, %cst_31 {dimension_numbers = #tpu.dot_dimension_numbers<[1], [0], [0], [1], [0, 0, 1, 1], [], []>} : vector<256x128xbf16>, vector<128x128xbf16>, vector<256x128xf32> -> vector<256x128xf32>
    %cst_32 = arith.constant dense<0.000000e+00> : vector<128xf32>
    %38 = vector.multi_reduction <add>, %37, %cst_32 [0] : vector<256x128xf32> to vector<128xf32>
    %39 = vector.shape_cast %38 : vector<128xf32> to vector<1x128xf32>
    %c7 = arith.constant 7 : index
    %c0_33 = arith.constant 0 : index
    %40 = vector.load %arg6[%c7, %c0_33] : memref<8x128xf32, #tpu.memory_space<vmem>>, vector<1x128xf32>
    tpu.vector_store %arg6[%c7, %c0_33], %39 {strides = array<i32>} : memref<8x128xf32, #tpu.memory_space<vmem>>, vector<1x128xf32>,
    %c0_34 = arith.constant 0 : index
    %c0_35 = arith.constant 0 : index
    %41 = vector.load %arg6[%c0_34, %c0_35] : memref<8x128xf32, #tpu.memory_space<vmem>>, vector<8x128xf32>
    %c0_36 = arith.constant 0 : index
    %c0_37 = arith.constant 0 : index
    %42 = vector.load %arg3[%c0_36, %c0_37] : memref<128x128xf32, #tpu.memory_space<vmem>>, vector<128x128xf32>
    %cst_38 = arith.constant dense<0.000000e+00> : vector<8x128xf32>
    %43 = tpu.matmul %41, %42, %cst_38 {dimension_numbers = #tpu.dot_dimension_numbers<[1], [0], [0], [1], [0, 0, 1, 1], [], []>} : vector<8x128xf32>, vector<128x128xf32>, vector<8x128xf32> -> vector<8x128xf32>
    %c0_39 = arith.constant 0 : index
    %c0_40 = arith.constant 0 : index
    %44 = vector.load %arg4[%c0_39, %c0_40] : memref<1x128xf32, #tpu.memory_space<vmem>>, vector<1x128xf32>
    %45 = vector.broadcast %44 : vector<1x128xf32> to vector<8x128xf32>
    %46 = arith.addf %43, %45 : vector<8x128xf32>
    %c0_41 = arith.constant 0 : index
    %c0_42 = arith.constant 0 : index
    %47 = vector.load %arg5[%c0_41, %c0_42] : memref<8x128xf32, #tpu.memory_space<vmem>>, vector<8x128xf32>
    tpu.vector_store %arg5[%c0_41, %c0_42], %46 {strides = array<i32>} : memref<8x128xf32, #tpu.memory_space<vmem>>, vector<8x128xf32>,
    return
  }
  func.func @transform_0(%arg0: i32) -> (i32, i32) {
    %c0_i32 = arith.constant 0 : i32
    %c0_i32_0 = arith.constant 0 : i32
    return %arg0, %c0_i32 : i32, i32
  }
  func.func @transform_1(%arg0: i32) -> (i32, i32) {
    %c0_i32 = arith.constant 0 : i32
    %c0_i32_0 = arith.constant 0 : i32
    %c0_i32_1 = arith.constant 0 : i32
    return %c0_i32, %c0_i32_0 : i32, i32
  }
  func.func @transform_2(%arg0: i32) -> (i32, i32) {
    %c0_i32 = arith.constant 0 : i32
    %c0_i32_0 = arith.constant 0 : i32
    %c0_i32_1 = arith.constant 0 : i32
    return %c0_i32, %c0_i32_0 : i32, i32
  }
  func.func @transform_3(%arg0: i32) -> (i32, i32) {
    %c0_i32 = arith.constant 0 : i32
    %c0_i32_0 = arith.constant 0 : i32
    %c0_i32_1 = arith.constant 0 : i32
    return %c0_i32, %c0_i32_0 : i32, i32
  }
  func.func @transform_4(%arg0: i32) -> (i32, i32) {
    %c0_i32 = arith.constant 0 : i32
    %c0_i32_0 = arith.constant 0 : i32
    return %arg0, %c0_i32 : i32, i32
  }
}

</mosaic_0001>

<bundles_post_ra>
// kernel: network_forward.1
= control target key start
LH: loop header
LB: loop body
LE: loop exit
PB: predicated region body
PF: predicated region fallthrough
CT: control target
= control target key end

     0   :  { %9 = vsyncpa [#allocation4], 0  ;;  %s4551_s0 = inlined_call_operand.vmem [shape: bf16[4096,128], index: 0, kind: input, shape index: {}]   ;;  %s4552_s1 = inlined_call_operand.vmem [shape: bf16[128,128], index: 1, kind: input, shape index: {}]   ;;  %s4553_s2 = inlined_call_operand.vmem [shape: f32[128,128], index: 2, kind: input, shape index: {}]   ;;  %s4554_s3 = inlined_call_operand.vmem [shape: f32[1,128], index: 3, kind: input, shape index: {}]   ;;  %s4555_s4 = inlined_call_operand.hbm [shape: f32[16,128], index: 4, kind: output, shape index: {}]  }
   0x1   :  { %11 = vsyncpa [#allocation4 + $0x1], 0  ;;  %s4094_s15 = smov 0   ;;  %s4096_s16 = smov 0  }
   0x2   :  { %s4098_s17 = smov 0   ;;  %s4100_s18 = smov 0  }
   0x3 LB: > { %s4115_s19 = sadd.s32 4294967295, %s4064_s18   ;;  %s3047_s20 = sadd.s32 4294967294, %s4064_s18   ;;  %s4064_s18 = sphi %s4100_s18, %s4561_s18   ;;  %s4060_s17 = sphi %s4098_s17, %s4560_s17   ;;  %s4056_s16 = sphi %s4096_s16, %s4559_s16   ;;  %s4052_s15 = sphi %s4094_s15, %s4558_s15  }
   0x4   : > { %s4119_s21 = sadd.s32 1, %s4064_s18   ;;  %s113_s22 = sadd.s32 1, %s4060_s17 }
   0x5   : > { %s110_s23 = ssub.s32 %s4064_s18, %s4119_s21  ;;  %p123_p0 = scmp.ne.s32.totalorder %s4060_s17, %s4056_s16 }
   0x6   : > { %p111_p1 = scmp.eq.s32.totalorder %s110_s23, 0  ;;  %p124_p2 = scmp.eq.s32.totalorder %s4115_s19, 1 }
   0x7   : > { %p129_p3 = scmp.ne.s32.totalorder %s4056_s16, %s4052_s15  ;;  %p130_p4 = scmp.eq.s32.totalorder %s3047_s20, 1 }
   0x8   : > { %s4130_s24 = scalar_select %p111_p1, %s4060_s17, %s113_s22  }
   0x9   : > { %p4132_p5 = por %p124_p2, %p123_p0  ;;  %p4136_p6 = por %p130_p4, %p129_p3 }
   0xa   : > { %p3050_p7 = scmp.ge.s32.totalorder %s4064_s18, 1  ;;  %p166_p8 = scmp.lt.s32.totalorder %s4064_s18, 3 }
   0xc   : > { %p167_p9 = pnand %p3050_p7, %p166_p8 }
   0xd   : > { %s3052_s29 = sshll.u32 (!%p167_p9), %s4115_s19, 8  ;;  %s189_s12 = sand.u32 (!%p167_p9), 1, %s4056_s16  }
   0xe   : > { %170 = sbr.rel (%p167_p9) target bundleno = 733 (0x2dd), region = 36  ;;  %p193_p10 = scmp.lt.s32.totalorder (!%p167_p9), %s3052_s29, 511 }
   0xf   : > { %s3051_s13 = sshll.u32 (!%p167_p9), %s189_s12, 3  ;;  %s3192_s20 = sshll.u32 (!%p167_p9), %s4115_s19, 7 }
  0x10   : > { %s191_s22 = scalar_lea.vmem (!%p167_p9), [#allocation3], %s3051_s13  ;;  %s2975_s30 = scalar_lea.sflag (!%p167_p9), [#allocation4], %s189_s12 }
  0x11   : > { %s2988_s23 = sshll.u32 (!%p167_p9), %s191_s22, 4  ;;  %s4068_s6 = smov (!%p167_p9), [#allocation3]   ;;  %s2989_s23 = int_to_ptr.vmem [resolvable:$true] %s2988_s23 }
  0x12   : > { %s4004_s5 = scalar_lea.vmem (!%p167_p9), %s2989_s23, 128  ;;  %s4008_s19 = sshll.u32 (!%p167_p9), %s4068_s6, 4  ;;  %s4009_s19 = int_to_ptr.vmem [resolvable:$false] %s4008_s19 }
  0x13   : > { %v4145_v0 = vld [vmem:[%s4552_s1 + $0x38] sm:$0xff]   ;;  %v4151_v1 = vld [vmem:[%s4552_s1 + $0x30] sm:$0xff]   ;;  %s4563_s29 = smov (!%p193_p10, %s3052_s29), 511  ;;  %v4162_v2 = vld [vmem:[%s4552_s1 + $0x28] sm:$0xff]   ;;  %vm4067_vm0 = vmmov 0   ;;  %p4005_p11 = scmp.ne.s32.totalorder %s2989_s23, %s4004_s5 }
  0x14   : > { %3404 = vmatprep.subr.bf16.mxu0 %v4145_v0  ;;  %3452 = vmatprep.subr.bf16.mxu1 %v4145_v0  ;;  %s3053_s8 = sshll.u32 %s4563_s29, 2  ;;  %v4174_v3 = vld [vmem:[%s4552_s1 + $0x20] sm:$0xff]   ;;  %v4187_v6 = vld [vmem:[%s4552_s1 + $0x18] sm:$0xff]   ;;  %v4196_v7 = vld [vmem:[%s4552_s1 + $0x10] sm:$0xff]   ;;  %s4516_s29 = scalar_lea.hbm %s4555_s4, %s3192_s20 }
  0x15   : > { %3405 = vmatpush3.bf16.msra.mxu0 %v4145_v0  ;;  %3453 = vmatpush3.bf16.msra.mxu1 %v4145_v0  ;;  %s4167_s11 = scalar_lea.vmem %s4551_s0, %s3053_s8  ;;  %v4205_v8 = vld [vmem:[%s4552_s1 + $0x8] sm:$0xff]   ;;  %v4214_v9 = vld [vmem:[%s4552_s1] sm:$0xff]   ;;  %p4006_p12 = pnand %p4005_p11, %p4132_p5 }
  0x16   : > { %3406 = vmatprep.subr.bf16.mxu0 %v4151_v1  ;;  %3454 = vmatprep.subr.bf16.mxu1 %v4151_v1  ;;  %v3872_v4 = vld [vmem:[%s4167_s11] sm:$0xff]   ;;  %v3874_v10 = vld [vmem:[%s4167_s11 + $0x8] sm:$0xff]   ;;  %v3876_v12 = vld [vmem:[%s4167_s11 + $0x10] sm:$0xff]   ;;  %s4010_s7 = scalar_lea.vmem %s4009_s19, 256  ;;  %p4011_p0 = scmp.lt.s32.totalorder %s2989_s23, %s4009_s19 }
  0x17   : > { %v3873_v5 = vld [vmem:[%s4167_s11 + $0x80] sm:$0xff]   ;;  %3420 = vmatprep.mubr.bf16.mxu0 %v3872_v4  ;;  %v3875_v11 = vld [vmem:[%s4167_s11 + $0x88] sm:$0xff]   ;;  %v3877_v13 = vld [vmem:[%s4167_s11 + $0x90] sm:$0xff]   ;;  %p4007_p13 = pneg %p4006_p12  ;;  %p4012_p1 = scmp.lt.s32.totalorder %s4010_s7, %s4004_s5 }
  0x18   : > { %3468 = vmatprep.mubr.bf16.mxu1 %v3873_v5  ;;  %v3878_v14 = vld [vmem:[%s4167_s11 + $0x18] sm:$0xff]   ;;  %v3880_v16 = vld [vmem:[%s4167_s11 + $0x20] sm:$0xff]   ;;  %v3882_v18 = vld [vmem:[%s4167_s11 + $0x28] sm:$0xff]  }
  0x19   : > { %3407 = vmatpush3.bf16.msra.mxu0 %v4151_v1  ;;  %3455 = vmatpush3.bf16.msra.mxu1 %v4151_v1  ;;  %v3879_v15 = vld [vmem:[%s4167_s11 + $0x98] sm:$0xff]   ;;  %v3881_v17 = vld [vmem:[%s4167_s11 + $0xa0] sm:$0xff]   ;;  %v3883_v19 = vld [vmem:[%s4167_s11 + $0xa8] sm:$0xff]   ;;  %p4013_p2 = por %p4012_p1, %p4011_p0 }
  0x1a   : > { %3408 = vmatprep.subr.bf16.mxu0 %v4162_v2  ;;  %3456 = vmatprep.subr.bf16.mxu1 %v4162_v2  ;;  %v3884_v20 = vld [vmem:[%s4167_s11 + $0x30] sm:$0xff]   ;;  %v3886_v22 = vld [vmem:[%s4167_s11 + $0x38] sm:$0xff]   ;;  %v3888_v24 = vld [vmem:[%s4167_s11 + $0x40] sm:$0xff]  }
  0x1b   : > { %v3885_v21 = vld [vmem:[%s4167_s11 + $0xb0] sm:$0xff]   ;;  %v3887_v23 = vld [vmem:[%s4167_s11 + $0xb8] sm:$0xff]   ;;  %v3889_v25 = vld [vmem:[%s4167_s11 + $0xc0] sm:$0xff]   ;;  %p4014_p3 = pnand %p4013_p2, %p4007_p13 }
  0x1c   : > { %v3890_v26 = vld [vmem:[%s4167_s11 + $0x48] sm:$0xff]   ;;  %v3892_v28 = vld [vmem:[%s4167_s11 + $0x50] sm:$0xff]   ;;  %v3894_v30 = vld [vmem:[%s4167_s11 + $0x58] sm:$0xff]  }
  0x1d   : > { %3409 = vmatpush3.bf16.msra.mxu0 %v4162_v2  ;;  %3457 = vmatpush3.bf16.msra.mxu1 %v4162_v2  ;;  %v3891_v27 = vld [vmem:[%s4167_s11 + $0xc8] sm:$0xff]   ;;  %v3893_v29 = vld [vmem:[%s4167_s11 + $0xd0] sm:$0xff]   ;;  %v3895_v31 = vld [vmem:[%s4167_s11 + $0xd8] sm:$0xff]  }
  0x1e   : > { %3410 = vmatprep.subr.bf16.mxu0 %v4174_v3  ;;  %3458 = vmatprep.subr.bf16.mxu1 %v4174_v3  ;;  %v3896_v32 = vld [vmem:[%s4167_s11 + $0x60] sm:$0xff]   ;;  %v3898_v34 = vld [vmem:[%s4167_s11 + $0x68] sm:$0xff]   ;;  %v3900_v36 = vld [vmem:[%s4167_s11 + $0x70] sm:$0xff]  }
  0x1f   : > { %v3897_v33 = vld [vmem:[%s4167_s11 + $0xe0] sm:$0xff]   ;;  %v3899_v35 = vld [vmem:[%s4167_s11 + $0xe8] sm:$0xff]   ;;  %v3901_v37 = vld [vmem:[%s4167_s11 + $0xf0] sm:$0xff]  }
  0x20   : > { %v3902_v38 = vld [vmem:[%s4167_s11 + $0x78] sm:$0xff]   ;;  %v3904_v40 = vld [vmem:[%s4167_s11 + $0x100] sm:$0xff]   ;;  %v3906_v42 = vld [vmem:[%s4167_s11 + $0x108] sm:$0xff]  }
  0x21   : > { %3411 = vmatpush3.bf16.msra.mxu0 %v4174_v3  ;;  %3459 = vmatpush3.bf16.msra.mxu1 %v4174_v3  ;;  %v3903_v39 = vld [vmem:[%s4167_s11 + $0xf8] sm:$0xff]   ;;  %v3905_v41 = vld [vmem:[%s4167_s11 + $0x180] sm:$0xff]   ;;  %v3907_v43 = vld [vmem:[%s4167_s11 + $0x188] sm:$0xff]  }
  0x22   : > { %3412 = vmatprep.subr.bf16.mxu0 %v4187_v6  ;;  %3460 = vmatprep.subr.bf16.mxu1 %v4187_v6  ;;  %v3908_v44 = vld [vmem:[%s4167_s11 + $0x110] sm:$0xff]   ;;  %v3910_v46 = vld [vmem:[%s4167_s11 + $0x118] sm:$0xff]   ;;  %v3912_v48 = vld [vmem:[%s4167_s11 + $0x120] sm:$0xff]  }
  0x23   : > { %v3909_v45 = vld [vmem:[%s4167_s11 + $0x190] sm:$0xff]   ;;  %v3911_v47 = vld [vmem:[%s4167_s11 + $0x198] sm:$0xff]   ;;  %v3913_v49 = vld [vmem:[%s4167_s11 + $0x1a0] sm:$0xff]  }
  0x24   : > { %v3914_v50 = vld [vmem:[%s4167_s11 + $0x128] sm:$0xff]   ;;  %v3916_v52 = vld [vmem:[%s4167_s11 + $0x130] sm:$0xff]   ;;  %v3918_v54 = vld [vmem:[%s4167_s11 + $0x138] sm:$0xff]  }
  0x25   : > { %3413 = vmatpush3.bf16.msra.mxu0 %v4187_v6  ;;  %3461 = vmatpush3.bf16.msra.mxu1 %v4187_v6  ;;  %v3915_v51 = vld [vmem:[%s4167_s11 + $0x1a8] sm:$0xff]   ;;  %v3917_v53 = vld [vmem:[%s4167_s11 + $0x1b0] sm:$0xff]   ;;  %v3919_v55 = vld [vmem:[%s4167_s11 + $0x1b8] sm:$0xff]  }
  0x26   : > { %3414 = vmatprep.subr.bf16.mxu0 %v4196_v7  ;;  %3462 = vmatprep.subr.bf16.mxu1 %v4196_v7  ;;  %v3920_v56 = vld [vmem:[%s4167_s11 + $0x140] sm:$0xff]   ;;  %v3922_v58 = vld [vmem:[%s4167_s11 + $0x148] sm:$0xff]   ;;  %v3924_v60 = vld [vmem:[%s4167_s11 + $0x150] sm:$0xff]  }
  0x27   : > { %v3921_v57 = vld [vmem:[%s4167_s11 + $0x1c0] sm:$0xff]   ;;  %v3923_v59 = vld [vmem:[%s4167_s11 + $0x1c8] sm:$0xff]   ;;  %v3925_v61 = vld [vmem:[%s4167_s11 + $0x1d0] sm:$0xff]  }
  0x28   : > { %v3926_v62 = vld [vmem:[%s4167_s11 + $0x158] sm:$0xff]   ;;  %v3930_v4 = vld [vmem:[%s4167_s11 + $0x168] sm:$0xff]   ;;  %v3932_v5 = vld [vmem:[%s4167_s11 + $0x170] sm:$0xff]  }
  0x29   : > { %3415 = vmatpush3.bf16.msra.mxu0 %v4196_v7  ;;  %3463 = vmatpush3.bf16.msra.mxu1 %v4196_v7  ;;  %v3927_v63 = vld [vmem:[%s4167_s11 + $0x1d8] sm:$0xff]  }
  0x2a   : > { %3416 = vmatprep.subr.bf16.mxu0 %v4205_v8  ;;  %3464 = vmatprep.subr.bf16.mxu1 %v4205_v8 }
  0x2d   : > { %3417 = vmatpush3.bf16.msra.mxu0 %v4205_v8  ;;  %3465 = vmatpush3.bf16.msra.mxu1 %v4205_v8 }
  0x2e   : > { %3418 = vmatprep.subr.bf16.mxu0 %v4214_v9  ;;  %3466 = vmatprep.subr.bf16.mxu1 %v4214_v9 }
  0x31   : > { %3419 = vmatpush3.bf16.msra.mxu0 %v4214_v9  ;;  %3467 = vmatpush3.bf16.msra.mxu1 %v4214_v9 }
  0x32   : > { %3500 = vmatprep.subr.bf16.mxu0 %v4145_v0  ;;  %3548 = vmatprep.subr.bf16.mxu1 %v4145_v0 }
  0x34   : > { %3421 = vmatmul.mubr.bf16.vlgmr.msra.gmra.mxu0 %v3874_v10  ;;  %3469 = vmatmul.mubr.bf16.vlgmr.msra.gmra.mxu1 %v3875_v11  ;;  %v3933_v10 = vld [vmem:[%s4167_s11 + $0x1f0] sm:$0xff]   ;;  %v3934_v11 = vld [vmem:[%s4167_s11 + $0x178] sm:$0xff]  }
  0x35   : > { %3501 = vmatpush3.bf16.msra.mxu0 %v4145_v0  ;;  %3549 = vmatpush3.bf16.msra.mxu1 %v4145_v0 }
  0x36   : > { %3424 = vmatprep.mubr.bf16.mxu0 %v3876_v12  ;;  %3472 = vmatprep.mubr.bf16.mxu1 %v3877_v13  ;;  %v3935_v12 = vld [vmem:[%s4167_s11 + $0x1f8] sm:$0xff]   ;;  %v3936_v13 = vld [vmem:[%s4167_s11 + $0x200] sm:$0xff]  }
  0x37   : > { %3502 = vmatprep.subr.bf16.mxu0 %v4151_v1  ;;  %3550 = vmatprep.subr.bf16.mxu1 %v4151_v1 }
  0x39   : > { %3503 = vmatpush3.bf16.msra.mxu0 %v4151_v1  ;;  %3551 = vmatpush3.bf16.msra.mxu1 %v4151_v1 }
  0x3a   : > { %3504 = vmatprep.subr.bf16.mxu0 %v4162_v2  ;;  %3552 = vmatprep.subr.bf16.mxu1 %v4162_v2 }
  0x3c   : > { %3425 = vmatmul.mubr.bf16.gmra.mxu0 %v3878_v14  ;;  %3473 = vmatmul.mubr.bf16.gmra.mxu1 %v3879_v15  ;;  %v3937_v14 = vld [vmem:[%s4167_s11 + $0x280] sm:$0xff]   ;;  %v3938_v15 = vld [vmem:[%s4167_s11 + $0x208] sm:$0xff]  }
  0x3d   : > { %3428 = vmatprep.mubr.bf16.mxu0 %v3880_v16  ;;  %3476 = vmatprep.mubr.bf16.mxu1 %v3881_v17  ;;  %v3939_v16 = vld [vmem:[%s4167_s11 + $0x288] sm:$0xff]   ;;  %v3940_v17 = vld [vmem:[%s4167_s11 + $0x210] sm:$0xff]  }
  0x3e   : > { %3505 = vmatpush3.bf16.msra.mxu0 %v4162_v2  ;;  %3553 = vmatpush3.bf16.msra.mxu1 %v4162_v2 }
  0x3f   : > { %3506 = vmatprep.subr.bf16.mxu0 %v4174_v3  ;;  %3554 = vmatprep.subr.bf16.mxu1 %v4174_v3 }
  0x42   : > { %3507 = vmatpush3.bf16.msra.mxu0 %v4174_v3  ;;  %3555 = vmatpush3.bf16.msra.mxu1 %v4174_v3 }
  0x43   : > { %3508 = vmatprep.subr.bf16.mxu0 %v4187_v6  ;;  %3556 = vmatprep.subr.bf16.mxu1 %v4187_v6 }
  0x44   : > { %3429 = vmatmul.mubr.bf16.gmra.mxu0 %v3882_v18  ;;  %3477 = vmatmul.mubr.bf16.gmra.mxu1 %v3883_v19  ;;  %v3941_v18 = vld [vmem:[%s4167_s11 + $0x290] sm:$0xff]   ;;  %v4000_v19 = vld [vmem:[%s4552_s1 + $0x38] sm:$0xff]  }
  0x45   : > { %3432 = vmatprep.mubr.bf16.mxu0 %v3884_v20  ;;  %3480 = vmatprep.mubr.bf16.mxu1 %v3885_v21  ;;  %v4001_v20 = vld [vmem:[%s4552_s1 + $0x30] sm:$0xff]   ;;  %v3942_v21 = vld [vmem:[%s4167_s11 + $0x218] sm:$0xff]  }
  0x46   : > { %3509 = vmatpush3.bf16.msra.mxu0 %v4187_v6  ;;  %3557 = vmatpush3.bf16.msra.mxu1 %v4187_v6 }
  0x47   : > { %3510 = vmatprep.subr.bf16.mxu0 %v4196_v7  ;;  %3558 = vmatprep.subr.bf16.mxu1 %v4196_v7 }
  0x4a   : > { %3511 = vmatpush3.bf16.msra.mxu0 %v4196_v7  ;;  %3559 = vmatpush3.bf16.msra.mxu1 %v4196_v7 }
  0x4b   : > { %3512 = vmatprep.subr.bf16.mxu0 %v4205_v8  ;;  %3560 = vmatprep.subr.bf16.mxu1 %v4205_v8 }
  0x4c   : > { %3433 = vmatmul.mubr.bf16.gmra.mxu0 %v3886_v22  ;;  %3481 = vmatmul.mubr.bf16.gmra.mxu1 %v3887_v23  ;;  %v3943_v22 = vld [vmem:[%s4167_s11 + $0x298] sm:$0xff]   ;;  %v3944_v23 = vld [vmem:[%s4167_s11 + $0x220] sm:$0xff]  }
  0x4d   : > { %3436 = vmatprep.mubr.bf16.mxu0 %v3888_v24  ;;  %3484 = vmatprep.mubr.bf16.mxu1 %v3889_v25  ;;  %v3945_v24 = vld [vmem:[%s4167_s11 + $0x2a0] sm:$0xff]   ;;  %v4002_v25 = vld [vmem:[%s4552_s1 + $0x28] sm:$0xff]  }
  0x4e   : > { %3513 = vmatpush3.bf16.msra.mxu0 %v4205_v8  ;;  %3561 = vmatpush3.bf16.msra.mxu1 %v4205_v8 }
  0x4f   : > { %3514 = vmatprep.subr.bf16.mxu0 %v4214_v9  ;;  %3562 = vmatprep.subr.bf16.mxu1 %v4214_v9 }
  0x52   : > { %3515 = vmatpush3.bf16.msra.mxu0 %v4214_v9  ;;  %3563 = vmatpush3.bf16.msra.mxu1 %v4214_v9 }
  0x53   : > { %3596 = vmatprep.subr.bf16.mxu0 %v4145_v0  ;;  %3644 = vmatprep.subr.bf16.mxu1 %v4145_v0 }
  0x54   : > { %3437 = vmatmul.mubr.bf16.gmra.mxu0 %v3890_v26  ;;  %3485 = vmatmul.mubr.bf16.gmra.mxu1 %v3891_v27  ;;  %v4003_v26 = vld [vmem:[%s4552_s1 + $0x20] sm:$0xff]   ;;  %v3946_v27 = vld [vmem:[%s4167_s11 + $0x228] sm:$0xff]  }
  0x55   : > { %3440 = vmatprep.mubr.bf16.mxu0 %v3892_v28  ;;  %3488 = vmatprep.mubr.bf16.mxu1 %v3893_v29  ;;  %v3947_v28 = vld [vmem:[%s4167_s11 + $0x2a8] sm:$0xff]   ;;  %v3948_v29 = vld [vmem:[%s4167_s11 + $0x230] sm:$0xff]  }
  0x5c   : > { %3441 = vmatmul.mubr.bf16.gmra.mxu0 %v3894_v30  ;;  %3489 = vmatmul.mubr.bf16.gmra.mxu1 %v3895_v31  ;;  %v3949_v30 = vld [vmem:[%s4167_s11 + $0x2b0] sm:$0xff]   ;;  %v3951_v31 = vld [vmem:[%s4167_s11 + $0x2b8] sm:$0xff]  }
  0x5d   : > { %3444 = vmatprep.mubr.bf16.mxu0 %v3896_v32  ;;  %3492 = vmatprep.mubr.bf16.mxu1 %v3897_v33  ;;  %v3952_v32 = vld [vmem:[%s4167_s11 + $0x240] sm:$0xff]  }
  0x5e   : > { %v3953_v33 = vld [vmem:[%s4167_s11 + $0x2c0] sm:$0xff]  }
  0x64   : > { %3445 = vmatmul.mubr.bf16.gmra.mxu0 %v3898_v34  ;;  %3493 = vmatmul.mubr.bf16.gmra.mxu1 %v3899_v35  ;;  %v3956_v34 = vld [vmem:[%s4167_s11 + $0x250] sm:$0xff]  }
  0x65   : > { %3448 = vmatprep.mubr.bf16.mxu0 %v3900_v36  ;;  %3496 = vmatprep.mubr.bf16.mxu1 %v3901_v37  ;;  %v3957_v35 = vld [vmem:[%s4167_s11 + $0x2d0] sm:$0xff]   ;;  %v3959_v36 = vld [vmem:[%s4167_s11 + $0x2d8] sm:$0xff]   ;;  %v3960_v37 = vld [vmem:[%s4167_s11 + $0x260] sm:$0xff]  }
  0x6c   : > { %3449 = vmatmul.mubr.bf16.gmra.mxu0 %v3902_v38  ;;  %3497 = vmatmul.mubr.bf16.gmra.mxu1 %v3903_v39  ;;  %v3961_v38 = vld [vmem:[%s4167_s11 + $0x2e0] sm:$0xff]   ;;  %v3962_v39 = vld [vmem:[%s4167_s11 + $0x268] sm:$0xff]  }
  0x6d   : > { %3516 = vmatprep.mubr.bf16.mxu0 %v3904_v40  ;;  %3564 = vmatprep.mubr.bf16.mxu1 %v3905_v41  ;;  %v3964_v40 = vld [vmem:[%s4167_s11 + $0x270] sm:$0xff]  }
  0x6e   : > { %v3965_v41 = vld [vmem:[%s4167_s11 + $0x2f0] sm:$0xff]  }
  0x74   : > { %3517 = vmatmul.mubr.bf16.vlgmr.msra.gmra.mxu0 %v3906_v42  ;;  %3565 = vmatmul.mubr.bf16.vlgmr.msra.gmra.mxu1 %v3907_v43  ;;  %v3966_v42 = vld [vmem:[%s4167_s11 + $0x278] sm:$0xff]  }
  0x75   : > { %3597 = vmatpush3.bf16.msra.mxu0 %v4145_v0  ;;  %3645 = vmatpush3.bf16.msra.mxu1 %v4145_v0  ;;  %v3967_v43 = vld [vmem:[%s4167_s11 + $0x2f8] sm:$0xff]  }
  0x76   : > { %3520 = vmatprep.mubr.bf16.mxu0 %v3908_v44  ;;  %3568 = vmatprep.mubr.bf16.mxu1 %v3909_v45  ;;  %v3968_v44 = vld [vmem:[%s4167_s11 + $0x300] sm:$0xff]  }
  0x77   : > { %3598 = vmatprep.subr.bf16.mxu0 %v4151_v1  ;;  %3646 = vmatprep.subr.bf16.mxu1 %v4151_v1  ;;  %v3969_v45 = vld [vmem:[%s4167_s11 + $0x380] sm:$0xff]  }
  0x79   : > { %3599 = vmatpush3.bf16.msra.mxu0 %v4151_v1  ;;  %3647 = vmatpush3.bf16.msra.mxu1 %v4151_v1  ;;  %v3928_v1 = vld [vmem:[%s4167_s11 + $0x160] sm:$0xff]  }
  0x7a   : > { %3600 = vmatprep.subr.bf16.mxu0 %v4162_v2  ;;  %3648 = vmatprep.subr.bf16.mxu1 %v4162_v2 }
  0x7c   : > { %3521 = vmatmul.mubr.bf16.gmra.mxu0 %v3910_v46  ;;  %3569 = vmatmul.mubr.bf16.gmra.mxu1 %v3911_v47  ;;  %v3970_v46 = vld [vmem:[%s4167_s11 + $0x308] sm:$0xff]  }
  0x7d   : > { %3524 = vmatprep.mubr.bf16.mxu0 %v3912_v48  ;;  %3572 = vmatprep.mubr.bf16.mxu1 %v3913_v49  ;;  %v3971_v47 = vld [vmem:[%s4167_s11 + $0x388] sm:$0xff]   ;;  %v3972_v48 = vld [vmem:[%s4167_s11 + $0x310] sm:$0xff]  }
  0x7e   : > { %3601 = vmatpush3.bf16.msra.mxu0 %v4162_v2  ;;  %3649 = vmatpush3.bf16.msra.mxu1 %v4162_v2  ;;  %v3929_v2 = vld [vmem:[%s4167_s11 + $0x1e0] sm:$0xff]   ;;  %v3973_v49 = vld [vmem:[%s4167_s11 + $0x390] sm:$0xff]  }
  0x7f   : > { %3602 = vmatprep.subr.bf16.mxu0 %v4174_v3  ;;  %3650 = vmatprep.subr.bf16.mxu1 %v4174_v3 }
  0x82   : > { %3603 = vmatpush3.bf16.msra.mxu0 %v4174_v3  ;;  %3651 = vmatpush3.bf16.msra.mxu1 %v4174_v3 }
  0x83   : > { %3604 = vmatprep.subr.bf16.mxu0 %v4187_v6  ;;  %3652 = vmatprep.subr.bf16.mxu1 %v4187_v6 }
  0x84   : > { %3525 = vmatmul.mubr.bf16.gmra.mxu0 %v3914_v50  ;;  %3573 = vmatmul.mubr.bf16.gmra.mxu1 %v3915_v51 }
  0x85   : > { %3528 = vmatprep.mubr.bf16.mxu0 %v3916_v52  ;;  %3576 = vmatprep.mubr.bf16.mxu1 %v3917_v53 }
  0x86   : > { %3605 = vmatpush3.bf16.msra.mxu0 %v4187_v6  ;;  %3653 = vmatpush3.bf16.msra.mxu1 %v4187_v6 }
  0x87   : > { %3606 = vmatprep.subr.bf16.mxu0 %v4196_v7  ;;  %3654 = vmatprep.subr.bf16.mxu1 %v4196_v7 }
  0x8a   : > { %3607 = vmatpush3.bf16.msra.mxu0 %v4196_v7  ;;  %3655 = vmatpush3.bf16.msra.mxu1 %v4196_v7 }
  0x8b   : > { %3608 = vmatprep.subr.bf16.mxu0 %v4205_v8  ;;  %3656 = vmatprep.subr.bf16.mxu1 %v4205_v8 }
  0x8c   : > { %3529 = vmatmul.mubr.bf16.gmra.mxu0 %v3918_v54  ;;  %3577 = vmatmul.mubr.bf16.gmra.mxu1 %v3919_v55 }
  0x8d   : > { %3532 = vmatprep.mubr.bf16.mxu0 %v3920_v56  ;;  %3580 = vmatprep.mubr.bf16.mxu1 %v3921_v57  ;;  %v3974_v56 = vld [vmem:[%s4167_s11 + $0x318] sm:$0xff]  }
  0x8e   : > { %3609 = vmatpush3.bf16.msra.mxu0 %v4205_v8  ;;  %3657 = vmatpush3.bf16.msra.mxu1 %v4205_v8  ;;  %v3975_v57 = vld [vmem:[%s4167_s11 + $0x398] sm:$0xff]  }
  0x8f   : > { %3610 = vmatprep.subr.bf16.mxu0 %v4214_v9  ;;  %3658 = vmatprep.subr.bf16.mxu1 %v4214_v9 }
  0x92   : > { %3611 = vmatpush3.bf16.msra.mxu0 %v4214_v9  ;;  %3659 = vmatpush3.bf16.msra.mxu1 %v4214_v9 }
  0x93   : > { %3692 = vmatprep.subr.bf16.mxu0 %v4145_v0  ;;  %3740 = vmatprep.subr.bf16.mxu1 %v4145_v0  ;;  %v3931_v0 = vld [vmem:[%s4167_s11 + $0x1e8] sm:$0xff]  }
  0x94   : > { %3533 = vmatmul.mubr.bf16.gmra.mxu0 %v3922_v58  ;;  %3581 = vmatmul.mubr.bf16.gmra.mxu1 %v3923_v59  ;;  %v3976_v58 = vld [vmem:[%s4167_s11 + $0x320] sm:$0xff]  }
  0x95   : > { %3536 = vmatprep.mubr.bf16.mxu0 %v3924_v60  ;;  %3584 = vmatprep.mubr.bf16.mxu1 %v3925_v61  ;;  %v3977_v59 = vld [vmem:[%s4167_s11 + $0x3a0] sm:$0xff]  }
  0x9c   : > { %3537 = vmatmul.mubr.bf16.gmra.mxu0 %v3926_v62  ;;  %3585 = vmatmul.mubr.bf16.gmra.mxu1 %v3927_v63 }
  0x9d   : > { %3540 = vmatprep.mubr.bf16.mxu0 %v3928_v1  ;;  %3588 = vmatprep.mubr.bf16.mxu1 %v3929_v2 }
  0xa4   : > { %3541 = vmatmul.mubr.bf16.gmra.mxu0 %v3930_v4  ;;  %3589 = vmatmul.mubr.bf16.gmra.mxu1 %v3931_v0 }
  0xa5   : > { %3544 = vmatprep.mubr.bf16.mxu0 %v3932_v5  ;;  %3592 = vmatprep.mubr.bf16.mxu1 %v3933_v10 }
  0xac   : > { %3545 = vmatmul.mubr.bf16.gmra.mxu0 %v3934_v11  ;;  %3593 = vmatmul.mubr.bf16.gmra.mxu1 %v3935_v12 }
  0xad   : > { %3612 = vmatprep.mubr.bf16.mxu0 %v3936_v13  ;;  %3660 = vmatprep.mubr.bf16.mxu1 %v3937_v14 }
  0xb4   : > { %3613 = vmatmul.mubr.bf16.vlgmr.msra.gmra.mxu0 %v3938_v15  ;;  %3661 = vmatmul.mubr.bf16.vlgmr.msra.gmra.mxu1 %v3939_v16  ;;  %v3978_v15 = vld [vmem:[%s4167_s11 + $0x328] sm:$0xff]  }
  0xb5   : > { %3693 = vmatpush3.bf16.msra.mxu0 %v4000_v19  ;;  %3741 = vmatpush3.bf16.msra.mxu1 %v4000_v19  ;;  %v3979_v16 = vld [vmem:[%s4167_s11 + $0x3a8] sm:$0xff]   ;;  %v3980_v19 = vld [vmem:[%s4167_s11 + $0x330] sm:$0xff]  }
  0xb6   : > { %3616 = vmatprep.mubr.bf16.mxu0 %v3940_v17  ;;  %3664 = vmatprep.mubr.bf16.mxu1 %v3941_v18 }
  0xb7   : > { %3694 = vmatprep.subr.bf16.mxu0 %v4001_v20  ;;  %3742 = vmatprep.subr.bf16.mxu1 %v4001_v20 }
  0xb9   : > { %3695 = vmatpush3.bf16.msra.mxu0 %v4001_v20  ;;  %3743 = vmatpush3.bf16.msra.mxu1 %v4001_v20  ;;  %v3981_v20 = vld [vmem:[%s4167_s11 + $0x3b0] sm:$0xff]  }
  0xba   : > { %3696 = vmatprep.subr.bf16.mxu0 %v4002_v25  ;;  %3744 = vmatprep.subr.bf16.mxu1 %v4002_v25 }
  0xbc   : > { %3617 = vmatmul.mubr.bf16.gmra.mxu0 %v3942_v21  ;;  %3665 = vmatmul.mubr.bf16.gmra.mxu1 %v3943_v22 }
  0xbd   : > { %3620 = vmatprep.mubr.bf16.mxu0 %v3944_v23  ;;  %3668 = vmatprep.mubr.bf16.mxu1 %v3945_v24 }
  0xbe   : > { %3697 = vmatpush3.bf16.msra.mxu0 %v4002_v25  ;;  %3745 = vmatpush3.bf16.msra.mxu1 %v4002_v25 }
  0xbf   : > { %3698 = vmatprep.subr.bf16.mxu0 %v4174_v3  ;;  %3746 = vmatprep.subr.bf16.mxu1 %v4003_v26  ;;  %v3950_v3 = vld [vmem:[%s4167_s11 + $0x238] sm:$0xff]  }
  0xc2   : > { %3699 = vmatpush3.bf16.msra.mxu0 %v4003_v26  ;;  %3747 = vmatpush3.bf16.msra.mxu1 %v4003_v26 }
  0xc3   : > { %3700 = vmatprep.subr.bf16.mxu0 %v4187_v6  ;;  %3748 = vmatprep.subr.bf16.mxu1 %v4187_v6 }
  0xc4   : > { %3621 = vmatmul.mubr.bf16.gmra.mxu0 %v3946_v27  ;;  %3669 = vmatmul.mubr.bf16.gmra.mxu1 %v3947_v28 }
  0xc5   : > { %3624 = vmatprep.mubr.bf16.mxu0 %v3948_v29  ;;  %3672 = vmatprep.mubr.bf16.mxu1 %v3949_v30 }
  0xc6   : > { %3701 = vmatpush3.bf16.msra.mxu0 %v4187_v6  ;;  %3749 = vmatpush3.bf16.msra.mxu1 %v4187_v6  ;;  %v3954_v6 = vld [vmem:[%s4167_s11 + $0x248] sm:$0xff]  }
  0xc7   : > { %3702 = vmatprep.subr.bf16.mxu0 %v4196_v7  ;;  %3750 = vmatprep.subr.bf16.mxu1 %v4196_v7 }
  0xca   : > { %3703 = vmatpush3.bf16.msra.mxu0 %v4196_v7  ;;  %3751 = vmatpush3.bf16.msra.mxu1 %v4196_v7  ;;  %v3955_v7 = vld [vmem:[%s4167_s11 + $0x2c8] sm:$0xff]  }
  0xcb   : > { %3704 = vmatprep.subr.bf16.mxu0 %v4205_v8  ;;  %3752 = vmatprep.subr.bf16.mxu1 %v4205_v8 }
  0xcc   : > { %3625 = vmatmul.mubr.bf16.gmra.mxu0 %v3950_v3  ;;  %3673 = vmatmul.mubr.bf16.gmra.mxu1 %v3951_v31 }
  0xcd   : > { %3628 = vmatprep.mubr.bf16.mxu0 %v3952_v32  ;;  %3676 = vmatprep.mubr.bf16.mxu1 %v3953_v33 }
  0xce   : > { %3705 = vmatpush3.bf16.msra.mxu0 %v4205_v8  ;;  %3753 = vmatpush3.bf16.msra.mxu1 %v4205_v8  ;;  %v3958_v8 = vld [vmem:[%s4167_s11 + $0x258] sm:$0xff]  }
  0xcf   : > { %3706 = vmatprep.subr.bf16.mxu0 %v4214_v9  ;;  %3754 = vmatprep.subr.bf16.mxu1 %v4214_v9 }
  0xd2   : > { %3707 = vmatpush3.bf16.msra.mxu0 %v4214_v9  ;;  %3755 = vmatpush3.bf16.msra.mxu1 %v4214_v9  ;;  %v3963_v9 = vld [vmem:[%s4167_s11 + $0x2e8] sm:$0xff]  }
  0xd4   : > { %3629 = vmatmul.mubr.bf16.gmra.mxu0 %v3954_v6  ;;  %3677 = vmatmul.mubr.bf16.gmra.mxu1 %v3955_v7  ;;  %v3982_v6 = vld [vmem:[%s4167_s11 + $0x338] sm:$0xff]  }
  0xd5   : > { %3632 = vmatprep.mubr.bf16.mxu0 %v3956_v34  ;;  %3680 = vmatprep.mubr.bf16.mxu1 %v3957_v35  ;;  %v3983_v7 = vld [vmem:[%s4167_s11 + $0x3b8] sm:$0xff]  }
  0xdc   : > { %3633 = vmatmul.mubr.bf16.gmra.mxu0 %v3958_v8  ;;  %3681 = vmatmul.mubr.bf16.gmra.mxu1 %v3959_v36  ;;  %v3984_v8 = vld [vmem:[%s4167_s11 + $0x340] sm:$0xff]  }
  0xdd   : > { %3636 = vmatprep.mubr.bf16.mxu0 %v3960_v37  ;;  %3684 = vmatprep.mubr.bf16.mxu1 %v3961_v38  ;;  %v3985_v36 = vld [vmem:[%s4167_s11 + $0x3c0] sm:$0xff]  }
  0xe4   : > { %3637 = vmatmul.mubr.bf16.gmra.mxu0 %v3962_v39  ;;  %3685 = vmatmul.mubr.bf16.gmra.mxu1 %v3963_v9 }
  0xe5   : > { %3640 = vmatprep.mubr.bf16.mxu0 %v3964_v40  ;;  %3688 = vmatprep.mubr.bf16.mxu1 %v3965_v41 }
  0xec   : > { %3641 = vmatmul.mubr.bf16.gmra.mxu0 %v3966_v42  ;;  %3689 = vmatmul.mubr.bf16.gmra.mxu1 %v3967_v43 }
  0xed   : > { %3708 = vmatprep.mubr.bf16.mxu0 %v3968_v44  ;;  %3756 = vmatprep.mubr.bf16.mxu1 %v3969_v45 }
  0xf4   : > { %v3422_v50 = vpop.f32.mrf.mxu0  ;;  %v3470_v51 = vpop.f32.mrf.mxu1  ;;  %3709 = vmatmul.mubr.bf16.vlgmr.msra.gmra.mxu0 %v3970_v46  ;;  %3757 = vmatmul.mubr.bf16.vlgmr.msra.gmra.mxu1 %v3971_v47 }
  0xf5   : > { %3712 = vmatprep.mubr.bf16.mxu0 %v3972_v48  ;;  %3760 = vmatprep.mubr.bf16.mxu1 %v3973_v49 }
  0xf6   : > { %v425_v52 = vpop.f32.mrf.mxu0  ;;  %v752_v53 = vpop.f32.mrf.mxu1 }
  0xf8   : > { %v3423_v54 = vpop.f32.mrf.mxu0  ;;  %v3471_v55 = vpop.f32.mrf.mxu1 }
  0xfa   : > { %v428_v60 = vpop.f32.mrf.mxu0  ;;  %v755_v61 = vpop.f32.mrf.mxu1 }
  0xfb   : > { %v552_v62 = vadd.f32 %v428_v60, %v425_v52  ;;  %v879_v63 = vadd.f32 %v755_v61, %v752_v53 }
  0xfc   : > { %v3426_v1 = vpop.f32.mrf.mxu0  ;;  %v3474_v2 = vpop.f32.mrf.mxu1  ;;  %3713 = vmatmul.mubr.bf16.gmra.mxu0 %v3974_v56  ;;  %3761 = vmatmul.mubr.bf16.gmra.mxu1 %v3975_v57 }
  0xfd   : > { %v553_v4 = vadd.f32 %v3422_v50, %v552_v62  ;;  %v880_v0 = vadd.f32 %v3470_v51, %v879_v63  ;;  %3716 = vmatprep.mubr.bf16.mxu0 %v3976_v58  ;;  %3764 = vmatprep.mubr.bf16.mxu1 %v3977_v59  ;;  %v3986_v50 = vld [vmem:[%s4167_s11 + $0x348] sm:$0xff]  }
  0xfe   : > { %v441_v5 = vpop.f32.mrf.mxu0  ;;  %v768_v10 = vpop.f32.mrf.mxu1  ;;  %v3987_v51 = vld [vmem:[%s4167_s11 + $0x3c8] sm:$0xff]  }
  0xff   : > { %v554_v11 = vadd.f32 %v3423_v54, %v553_v4  ;;  %v881_v12 = vadd.f32 %v3471_v55, %v880_v0  ;;  %v3988_v54 = vld [vmem:[%s4167_s11 + $0x350] sm:$0xff]  }
 0x100   : > { %v3427_v13 = vpop.f32.mrf.mxu0  ;;  %v3475_v14 = vpop.f32.mrf.mxu1  ;;  %v3989_v55 = vld [vmem:[%s4167_s11 + $0x3d0] sm:$0xff]  }
 0x101   : > { %v555_v17 = vadd.f32 %v554_v11, %v441_v5  ;;  %v882_v18 = vadd.f32 %v881_v12, %v768_v10  ;;  %v3990_v11 = vld [vmem:[%s4167_s11 + $0x358] sm:$0xff]  }
 0x102   : > { %v444_v21 = vpop.f32.mrf.mxu0  ;;  %v771_v22 = vpop.f32.mrf.mxu1  ;;  %v3991_v12 = vld [vmem:[%s4167_s11 + $0x3d8] sm:$0xff]  }
 0x103   : > { %v556_v23 = vadd.f32 %v555_v17, %v444_v21  ;;  %v883_v24 = vadd.f32 %v882_v18, %v771_v22 }
 0x104   : > { %v3430_v25 = vpop.f32.mrf.mxu0  ;;  %v3478_v26 = vpop.f32.mrf.mxu1  ;;  %3717 = vmatmul.mubr.bf16.gmra.mxu0 %v3978_v15  ;;  %3765 = vmatmul.mubr.bf16.gmra.mxu1 %v3979_v16  ;;  %v3992_v15 = vld [vmem:[%s4167_s11 + $0x360] sm:$0xff]  }
 0x105   : > { %v557_v27 = vadd.f32 %v3426_v1, %v556_v23  ;;  %v884_v28 = vadd.f32 %v3474_v2, %v883_v24  ;;  %3720 = vmatprep.mubr.bf16.mxu0 %v3980_v19  ;;  %3768 = vmatprep.mubr.bf16.mxu1 %v3981_v20  ;;  %v3993_v16 = vld [vmem:[%s4167_s11 + $0x3e0] sm:$0xff]  }
 0x106   : > { %v457_v29 = vpop.f32.mrf.mxu0  ;;  %v784_v30 = vpop.f32.mrf.mxu1 }
 0x107   : > { %v558_v3 = vadd.f32 %v3427_v13, %v557_v27  ;;  %v885_v31 = vadd.f32 %v3475_v14, %v884_v28 }
 0x108   : > { %v3431_v32 = vpop.f32.mrf.mxu0  ;;  %v3479_v33 = vpop.f32.mrf.mxu1 }
 0x109   : > { %v559_v34 = vadd.f32 %v558_v3, %v457_v29  ;;  %v886_v35 = vadd.f32 %v885_v31, %v784_v30  ;;  %v3994_v3 = vld [vmem:[%s4167_s11 + $0x368] sm:$0xff]  }
 0x10a   : > { %v460_v37 = vpop.f32.mrf.mxu0  ;;  %v787_v38 = vpop.f32.mrf.mxu1  ;;  %v3995_v31 = vld [vmem:[%s4167_s11 + $0x3e8] sm:$0xff]  }
 0x10b   : > { %v560_v39 = vadd.f32 %v559_v34, %v460_v37  ;;  %v887_v9 = vadd.f32 %v886_v35, %v787_v38 }
 0x10c   : > { %v3434_v40 = vpop.f32.mrf.mxu0  ;;  %v3482_v41 = vpop.f32.mrf.mxu1  ;;  %3721 = vmatmul.mubr.bf16.gmra.mxu0 %v3982_v6  ;;  %3769 = vmatmul.mubr.bf16.gmra.mxu1 %v3983_v7  ;;  %v3996_v6 = vld [vmem:[%s4167_s11 + $0x370] sm:$0xff]  }
 0x10d   : > { %v561_v42 = vadd.f32 %v3430_v25, %v560_v39  ;;  %v888_v43 = vadd.f32 %v3478_v26, %v887_v9  ;;  %3724 = vmatprep.mubr.bf16.mxu0 %v3984_v8  ;;  %3772 = vmatprep.mubr.bf16.mxu1 %v3985_v36  ;;  %v3997_v7 = vld [vmem:[%s4167_s11 + $0x3f0] sm:$0xff]  }
 0x10e   : > { %v473_v44 = vpop.f32.mrf.mxu0  ;;  %v800_v45 = vpop.f32.mrf.mxu1 }
 0x10f   : > { %v562_v46 = vadd.f32 %v3431_v32, %v561_v42  ;;  %v889_v47 = vadd.f32 %v3479_v33, %v888_v43 }
 0x110   : > { %v3435_v48 = vpop.f32.mrf.mxu0  ;;  %v3483_v49 = vpop.f32.mrf.mxu1 }
 0x111   : > { %v563_v52 = vadd.f32 %v562_v46, %v473_v44  ;;  %v890_v53 = vadd.f32 %v889_v47, %v800_v45  ;;  %v3998_v46 = vld [vmem:[%s4167_s11 + $0x378] sm:$0xff]  }
 0x112   : > { %v476_v56 = vpop.f32.mrf.mxu0  ;;  %v803_v57 = vpop.f32.mrf.mxu1  ;;  %v3999_v47 = vld [vmem:[%s4167_s11 + $0x3f8] sm:$0xff]  }
 0x113   : > { %v564_v58 = vadd.f32 %v563_v52, %v476_v56  ;;  %v891_v59 = vadd.f32 %v890_v53, %v803_v57 }
 0x114   : > { %v3438_v60 = vpop.f32.mrf.mxu0  ;;  %v3486_v61 = vpop.f32.mrf.mxu1  ;;  %3725 = vmatmul.mubr.bf16.gmra.mxu0 %v3986_v50  ;;  %3773 = vmatmul.mubr.bf16.gmra.mxu1 %v3987_v51 }
 0x115   : > { %v565_v62 = vadd.f32 %v3434_v40, %v564_v58  ;;  %v892_v63 = vadd.f32 %v3482_v41, %v891_v59  ;;  %3728 = vmatprep.mubr.bf16.mxu0 %v3988_v54  ;;  %3776 = vmatprep.mubr.bf16.mxu1 %v3989_v55 }
 0x116   : > { %v489_v1 = vpop.f32.mrf.mxu0  ;;  %v816_v2 = vpop.f32.mrf.mxu1 }
 0x117   : > { %v566_v4 = vadd.f32 %v3435_v48, %v565_v62  ;;  %v893_v0 = vadd.f32 %v3483_v49, %v892_v63 }
 0x118   : > { %v3439_v5 = vpop.f32.mrf.mxu0  ;;  %v3487_v10 = vpop.f32.mrf.mxu1 }
 0x119   : > { %v567_v13 = vadd.f32 %v566_v4, %v489_v1  ;;  %v894_v14 = vadd.f32 %v893_v0, %v816_v2 }
 0x11a   : > { %v492_v17 = vpop.f32.mrf.mxu0  ;;  %v819_v18 = vpop.f32.mrf.mxu1 }
 0x11b   : > { %v568_v19 = vadd.f32 %v567_v13, %v492_v17  ;;  %v895_v20 = vadd.f32 %v894_v14, %v819_v18 }
 0x11c   : > { %v3442_v21 = vpop.f32.mrf.mxu0  ;;  %v3490_v22 = vpop.f32.mrf.mxu1  ;;  %3729 = vmatmul.mubr.bf16.gmra.mxu0 %v3990_v11  ;;  %3777 = vmatmul.mubr.bf16.gmra.mxu1 %v3991_v12 }
 0x11d   : > { %v569_v23 = vadd.f32 %v3438_v60, %v568_v19  ;;  %v896_v24 = vadd.f32 %v3486_v61, %v895_v20  ;;  %3732 = vmatprep.mubr.bf16.mxu0 %v3992_v15  ;;  %3780 = vmatprep.mubr.bf16.mxu1 %v3993_v16 }
 0x11e   : > { %v505_v25 = vpop.f32.mrf.mxu0  ;;  %v832_v26 = vpop.f32.mrf.mxu1 }
 0x11f   : > { %v570_v27 = vadd.f32 %v3439_v5, %v569_v23  ;;  %v897_v28 = vadd.f32 %v3487_v10, %v896_v24 }
 0x120   : > { %v3443_v29 = vpop.f32.mrf.mxu0  ;;  %v3491_v30 = vpop.f32.mrf.mxu1 }
 0x121   : > { %v571_v32 = vadd.f32 %v570_v27, %v505_v25  ;;  %v898_v33 = vadd.f32 %v897_v28, %v832_v26 }
 0x122   : > { %v508_v34 = vpop.f32.mrf.mxu0  ;;  %v835_v35 = vpop.f32.mrf.mxu1 }
 0x123   : > { %v572_v8 = vadd.f32 %v571_v32, %v508_v34  ;;  %v899_v36 = vadd.f32 %v898_v33, %v835_v35 }
 0x124   : > { %v3446_v37 = vpop.f32.mrf.mxu0  ;;  %v3494_v38 = vpop.f32.mrf.mxu1  ;;  %3733 = vmatmul.mubr.bf16.gmra.mxu0 %v3994_v3  ;;  %3781 = vmatmul.mubr.bf16.gmra.mxu1 %v3995_v31 }
 0x125   : > { %v573_v39 = vadd.f32 %v3442_v21, %v572_v8  ;;  %v900_v9 = vadd.f32 %v3490_v22, %v899_v36  ;;  %3736 = vmatprep.mubr.bf16.mxu0 %v3996_v6  ;;  %3784 = vmatprep.mubr.bf16.mxu1 %v3997_v7 }
 0x126   : > { %v521_v40 = vpop.f32.mrf.mxu0  ;;  %v848_v41 = vpop.f32.mrf.mxu1 }
 0x127   : > { %v574_v42 = vadd.f32 %v3443_v29, %v573_v39  ;;  %v901_v43 = vadd.f32 %v3491_v30, %v900_v9 }
 0x128   : > { %v3447_v44 = vpop.f32.mrf.mxu0  ;;  %v3495_v45 = vpop.f32.mrf.mxu1 }
 0x129   : > { %v575_v48 = vadd.f32 %v574_v42, %v521_v40  ;;  %v902_v49 = vadd.f32 %v901_v43, %v848_v41 }
 0x12a   : > { %v524_v50 = vpop.f32.mrf.mxu0  ;;  %v851_v51 = vpop.f32.mrf.mxu1 }
 0x12b   : > { %v576_v52 = vadd.f32 %v575_v48, %v524_v50  ;;  %v903_v53 = vadd.f32 %v902_v49, %v851_v51 }
 0x12c   : > { %v3450_v54 = vpop.f32.mrf.mxu0  ;;  %v3498_v55 = vpop.f32.mrf.mxu1  ;;  %3737 = vmatmul.mubr.bf16.gmra.mxu0 %v3998_v46  ;;  %3785 = vmatmul.mubr.bf16.gmra.mxu1 %v3999_v47 }
 0x12d   : > { %v577_v56 = vadd.f32 %v3446_v37, %v576_v52  ;;  %v904_v57 = vadd.f32 %v3494_v38, %v903_v53 }
 0x12e   : > { %v537_v58 = vpop.f32.mrf.mxu0  ;;  %v864_v59 = vpop.f32.mrf.mxu1 }
 0x12f   : > { %v578_v60 = vadd.f32 %v3447_v44, %v577_v56  ;;  %v905_v61 = vadd.f32 %v3495_v45, %v904_v57 }
 0x130   : > { %v3451_v62 = vpop.f32.mrf.mxu0  ;;  %v3499_v63 = vpop.f32.mrf.mxu1 }
 0x131   : > { %v579_v1 = vadd.f32 %v578_v60, %v537_v58  ;;  %v906_v2 = vadd.f32 %v905_v61, %v864_v59 }
 0x132   : > { %v540_v4 = vpop.f32.mrf.mxu0  ;;  %v867_v0 = vpop.f32.mrf.mxu1 }
 0x133   : > { %v580_v5 = vadd.f32 %v579_v1, %v540_v4  ;;  %v907_v10 = vadd.f32 %v906_v2, %v867_v0 }
 0x134   : > { %v3518_v11 = vpop.f32.mrf.mxu0  ;;  %v3566_v12 = vpop.f32.mrf.mxu1 }
 0x135   : > { %v581_v13 = vadd.f32 %v3450_v54, %v580_v5  ;;  %v908_v14 = vadd.f32 %v3498_v55, %v907_v10 }
 0x136   : > { %v1079_v15 = vpop.f32.mrf.mxu0  ;;  %v1406_v16 = vpop.f32.mrf.mxu1 }
 0x137   : > { %v582_v17 = vadd.f32 %v3451_v62, %v581_v13  ;;  %v909_v18 = vadd.f32 %v3499_v63, %v908_v14 }
 0x138   : > { %v3519_v19 = vpop.f32.mrf.mxu0  ;;  %v3567_v20 = vpop.f32.mrf.mxu1 }
 0x139   : > { %v583_v21 = vrot.slane %v582_v17, 4  ;;  %v910_v22 = vrot.slane %v909_v18, 4 }
 0x13a   : > { %v1082_v23 = vpop.f32.mrf.mxu0  ;;  %v1409_v24 = vpop.f32.mrf.mxu1 }
 0x13b   : > { %v584_v25 = vadd.f32 %v583_v21, %v582_v17  ;;  %v911_v26 = vadd.f32 %v910_v22, %v909_v18  ;;  %v1206_v27 = vadd.f32 %v1082_v23, %v1079_v15  ;;  %v1533_v28 = vadd.f32 %v1409_v24, %v1406_v16  ;;  %v2895_v18 = vld [vmem:[%s4553_s2 + $0x78] sm:$0xff] }
 0x13c   : > { %v3522_v29 = vpop.f32.mrf.mxu0  ;;  %v3570_v30 = vpop.f32.mrf.mxu1 }
 0x13d   : > { %v585_v3 = vrot.slane %v584_v25, 2  ;;  %v912_v31 = vrot.slane %v911_v26, 2  ;;  %v1207_v32 = vadd.f32 %v3518_v11, %v1206_v27  ;;  %v1534_v33 = vadd.f32 %v3566_v12, %v1533_v28  ;;  %v2894_v27 = vld [vmem:[%s4553_s2 + $0x70] sm:$0xff] }
 0x13e   : > { %v1095_v6 = vpop.f32.mrf.mxu0  ;;  %v1422_v7 = vpop.f32.mrf.mxu1  ;;  %v4066_v11 = vmov 0.0  }
 0x13f   : > { %v586_v34 = vadd.f32 %v585_v3, %v584_v25  ;;  %v913_v35 = vadd.f32 %v912_v31, %v911_v26  ;;  %v1208_v8 = vadd.f32 %v3519_v19, %v1207_v32  ;;  %v1535_v36 = vadd.f32 %v3567_v20, %v1534_v33  ;;  %3788 = vmatprep.subr.mxu0 %v4066_v11 }
 0x140   : > { %v3523_v37 = vpop.f32.mrf.mxu0  ;;  %v3571_v38 = vpop.f32.mrf.mxu1  ;;  %3789 = vmatpush3.msra.mxu0 %v2895_v18  ;;  %v2888_v18 = vld [vmem:[%s4553_s2 + $0x40] sm:$0xff]  ;;  %3820 = vmatprep.mubr.msk.f32.mxu0 %vm4067_vm0, %v4066_v11 }
 0x141   : > { %v587_v39 = vrot.slane %v586_v34, 1  ;;  %v914_v9 = vrot.slane %v913_v35, 1  ;;  %v1209_v40 = vadd.f32 %v1208_v8, %v1095_v6  ;;  %v1536_v41 = vadd.f32 %v1535_v36, %v1422_v7  ;;  %3790 = vmatprep.subr.mxu0 %v4066_v11  ;;  %v2893_v7 = vld [vmem:[%s4553_s2 + $0x68] sm:$0xff] }
 0x142   : > { %v1098_v42 = vpop.f32.mrf.mxu0  ;;  %v1425_v43 = vpop.f32.mrf.mxu1  ;;  %3791 = vmatpush3.msra.mxu0 %v2894_v27  ;;  %v2887_v27 = vld [vmem:[%s4553_s2 + $0x38] sm:$0xff] }
 0x143   : > { %v588_v44 = vadd.f32 %v587_v39, %v586_v34  ;;  %v915_v45 = vadd.f32 %v914_v9, %v913_v35  ;;  %v1210_v46 = vadd.f32 %v1209_v40, %v1098_v42  ;;  %v1537_v47 = vadd.f32 %v1536_v41, %v1425_v43  ;;  %3792 = vmatprep.subr.mxu0 %v4066_v11  ;;  %v2892_v40 = vld [vmem:[%s4553_s2 + $0x60] sm:$0xff] }
 0x144   : > { %v3526_v48 = vpop.f32.mrf.mxu0  ;;  %v3574_v49 = vpop.f32.mrf.mxu1  ;;  %3793 = vmatpush3.msra.mxu0 %v2893_v7 }
 0x145   : > { %589 = vst [vmem:[#allocation2] sm:$0x1] %v588_v44  ;;  %916 = vst [vmem:[#allocation2 + $0x1] sm:$0x1] %v915_v45  ;;  %v1211_v50 = vadd.f32 %v3522_v29, %v1210_v46  ;;  %v1538_v51 = vadd.f32 %v3570_v30, %v1537_v47  ;;  %3794 = vmatprep.subr.mxu0 %v4066_v11 }
 0x146   : > { %v1111_v52 = vpop.f32.mrf.mxu0  ;;  %v1438_v53 = vpop.f32.mrf.mxu1  ;;  %3795 = vmatpush3.msra.mxu0 %v2892_v40 }
 0x147   : > { %v1212_v54 = vadd.f32 %v3523_v37, %v1211_v50  ;;  %v1539_v55 = vadd.f32 %v3571_v38, %v1538_v51  ;;  %3796 = vmatprep.subr.mxu0 %v4066_v11 }
 0x148   : > { %v3527_v56 = vpop.f32.mrf.mxu0  ;;  %v3575_v57 = vpop.f32.mrf.mxu1 }
 0x149   : > { %v1213_v58 = vadd.f32 %v1212_v54, %v1111_v52  ;;  %v1540_v59 = vadd.f32 %v1539_v55, %v1438_v53 }
 0x14a   : > { %v1114_v60 = vpop.f32.mrf.mxu0  ;;  %v1441_v61 = vpop.f32.mrf.mxu1 }
 0x14b   : > { %v1214_v62 = vadd.f32 %v1213_v58, %v1114_v60  ;;  %v1541_v63 = vadd.f32 %v1540_v59, %v1441_v61  ;;  %v2890_v58 = vld [vmem:[%s4553_s2 + $0x50] sm:$0xff] }
 0x14c   : > { %v3530_v1 = vpop.f32.mrf.mxu0  ;;  %v3578_v2 = vpop.f32.mrf.mxu1 }
 0x14d   : > { %v1215_v4 = vadd.f32 %v3526_v48, %v1214_v62  ;;  %v1542_v0 = vadd.f32 %v3574_v49, %v1541_v63  ;;  %v2891_v49 = vld [vmem:[%s4553_s2 + $0x58] sm:$0xff] }
 0x14e   : > { %v1127_v5 = vpop.f32.mrf.mxu0  ;;  %v1454_v10 = vpop.f32.mrf.mxu1  ;;  %3797 = vmatpush3.msra.mxu0 %v2891_v49 }
 0x14f   : > { %v1216_v12 = vadd.f32 %v3527_v56, %v1215_v4  ;;  %v1543_v13 = vadd.f32 %v3575_v57, %v1542_v0  ;;  %3798 = vmatprep.subr.mxu0 %v4066_v11  ;;  %v2889_v0 = vld [vmem:[%s4553_s2 + $0x48] sm:$0xff] }
 0x150   : > { %v3531_v14 = vpop.f32.mrf.mxu0  ;;  %v3579_v15 = vpop.f32.mrf.mxu1  ;;  %3799 = vmatpush3.msra.mxu0 %v2890_v58 }
 0x151   : > { %v1217_v16 = vadd.f32 %v1216_v12, %v1127_v5  ;;  %v1544_v17 = vadd.f32 %v1543_v13, %v1454_v10  ;;  %3800 = vmatprep.subr.mxu0 %v4066_v11 }
 0x152   : > { %v1130_v19 = vpop.f32.mrf.mxu0  ;;  %v1457_v20 = vpop.f32.mrf.mxu1  ;;  %3801 = vmatpush3.msra.mxu0 %v2889_v0 }
 0x153   : > { %v1218_v21 = vadd.f32 %v1217_v16, %v1130_v19  ;;  %v1545_v22 = vadd.f32 %v1544_v17, %v1457_v20  ;;  %3802 = vmatprep.subr.mxu0 %v4066_v11 }
 0x154   : > { %v3534_v23 = vpop.f32.mrf.mxu0  ;;  %v3582_v24 = vpop.f32.mrf.mxu1  ;;  %3803 = vmatpush3.msra.mxu0 %v2888_v18  ;;  %v2883_v18 = vld [vmem:[%s4553_s2 + $0x18] sm:$0xff] }
 0x155   : > { %v1219_v25 = vadd.f32 %v3530_v1, %v1218_v21  ;;  %v1546_v26 = vadd.f32 %v3578_v2, %v1545_v22  ;;  %3804 = vmatprep.subr.mxu0 %v4066_v11 }
 0x156   : > { %v1143_v28 = vpop.f32.mrf.mxu0  ;;  %v1470_v29 = vpop.f32.mrf.mxu1  ;;  %3805 = vmatpush3.msra.mxu0 %v2887_v27 }
 0x157   : > { %v1220_v30 = vadd.f32 %v3531_v14, %v1219_v25  ;;  %v1547_v3 = vadd.f32 %v3579_v15, %v1546_v26  ;;  %3806 = vmatprep.subr.mxu0 %v4066_v11 }
 0x158   : > { %v3535_v31 = vpop.f32.mrf.mxu0  ;;  %v3583_v32 = vpop.f32.mrf.mxu1 }
 0x159   : > { %v1221_v33 = vadd.f32 %v1220_v30, %v1143_v28  ;;  %v1548_v6 = vadd.f32 %v1547_v3, %v1470_v29 }
 0x15a   : > { %v1146_v34 = vpop.f32.mrf.mxu0  ;;  %v1473_v35 = vpop.f32.mrf.mxu1 }
 0x15b   : > { %v1222_v8 = vadd.f32 %v1221_v33, %v1146_v34  ;;  %v1549_v36 = vadd.f32 %v1548_v6, %v1473_v35 }
 0x15c   : > { %v3538_v37 = vpop.f32.mrf.mxu0  ;;  %v3586_v38 = vpop.f32.mrf.mxu1 }
 0x15d   : > { %v1223_v39 = vadd.f32 %v3534_v23, %v1222_v8  ;;  %v1550_v9 = vadd.f32 %v3582_v24, %v1549_v36 }
 0x15e   : > { %v1159_v41 = vpop.f32.mrf.mxu0  ;;  %v1486_v42 = vpop.f32.mrf.mxu1 }
 0x15f   : > { %v1224_v43 = vadd.f32 %v3535_v31, %v1223_v39  ;;  %v1551_v44 = vadd.f32 %v3583_v32, %v1550_v9 }
 0x160   : > { %v3539_v45 = vpop.f32.mrf.mxu0  ;;  %v3587_v46 = vpop.f32.mrf.mxu1 }
 0x161   : > { %v1225_v47 = vadd.f32 %v1224_v43, %v1159_v41  ;;  %v1552_v48 = vadd.f32 %v1551_v44, %v1486_v42 }
 0x162   : > { %v1162_v50 = vpop.f32.mrf.mxu0  ;;  %v1489_v51 = vpop.f32.mrf.mxu1 }
 0x163   : > { %v1226_v52 = vadd.f32 %v1225_v47, %v1162_v50  ;;  %v1553_v53 = vadd.f32 %v1552_v48, %v1489_v51 }
 0x164   : > { %v3542_v54 = vpop.f32.mrf.mxu0  ;;  %v3590_v55 = vpop.f32.mrf.mxu1 }
 0x165   : > { %v1227_v56 = vadd.f32 %v3538_v37, %v1226_v52  ;;  %v1554_v57 = vadd.f32 %v3586_v38, %v1553_v53 }
 0x166   : > { %v1175_v59 = vpop.f32.mrf.mxu0  ;;  %v1502_v60 = vpop.f32.mrf.mxu1 }
 0x167   : > { %v1228_v61 = vadd.f32 %v3539_v45, %v1227_v56  ;;  %v1555_v62 = vadd.f32 %v3587_v46, %v1554_v57  ;;  %v2886_v57 = vld [vmem:[%s4553_s2 + $0x30] sm:$0xff] }
 0x168   : > { %v3543_v63 = vpop.f32.mrf.mxu0  ;;  %v3591_v1 = vpop.f32.mrf.mxu1  ;;  %3807 = vmatpush3.msra.mxu0 %v2886_v57 }
 0x169   : > { %v1229_v2 = vadd.f32 %v1228_v61, %v1175_v59  ;;  %v1556_v4 = vadd.f32 %v1555_v62, %v1502_v60  ;;  %3808 = vmatprep.subr.mxu0 %v4066_v11 }
 0x16a   : > { %v1178_v5 = vpop.f32.mrf.mxu0  ;;  %v1505_v10 = vpop.f32.mrf.mxu1 }
 0x16b   : > { %v1230_v12 = vadd.f32 %v1229_v2, %v1178_v5  ;;  %v1557_v13 = vadd.f32 %v1556_v4, %v1505_v10 }
 0x16c   : > { %v3546_v14 = vpop.f32.mrf.mxu0  ;;  %v3594_v15 = vpop.f32.mrf.mxu1 }
 0x16d   : > { %v1231_v16 = vadd.f32 %v3542_v54, %v1230_v12  ;;  %v1558_v17 = vadd.f32 %v3590_v55, %v1557_v13  ;;  %v2884_v13 = vld [vmem:[%s4553_s2 + $0x20] sm:$0xff] }
 0x16e   : > { %v1191_v19 = vpop.f32.mrf.mxu0  ;;  %v1518_v20 = vpop.f32.mrf.mxu1 }
 0x16f   : > { %v1232_v21 = vadd.f32 %v3543_v63, %v1231_v16  ;;  %v1559_v22 = vadd.f32 %v3591_v1, %v1558_v17  ;;  %v2885_v1 = vld [vmem:[%s4553_s2 + $0x28] sm:$0xff] }
 0x170   : > { %v3547_v23 = vpop.f32.mrf.mxu0  ;;  %v3595_v24 = vpop.f32.mrf.mxu1  ;;  %3809 = vmatpush3.msra.mxu0 %v2885_v1 }
 0x171   : > { %v1233_v25 = vadd.f32 %v1232_v21, %v1191_v19  ;;  %v1560_v26 = vadd.f32 %v1559_v22, %v1518_v20  ;;  %3810 = vmatprep.subr.mxu0 %v4066_v11  ;;  %v2882_v19 = vld [vmem:[%s4553_s2 + $0x10] sm:$0xff] }
 0x172   : > { %v1194_v28 = vpop.f32.mrf.mxu0  ;;  %v1521_v29 = vpop.f32.mrf.mxu1  ;;  %3811 = vmatpush3.msra.mxu0 %v2884_v13 }
 0x173   : > { %v1234_v30 = vadd.f32 %v1233_v25, %v1194_v28  ;;  %v1561_v3 = vadd.f32 %v1560_v26, %v1521_v29  ;;  %3812 = vmatprep.subr.mxu0 %v4066_v11  ;;  %v2880_v29 = vld [vmem:[%s4553_s2] sm:$0xff] }
 0x174   : > { %v3614_v31 = vpop.f32.mrf.mxu0  ;;  %v3662_v32 = vpop.f32.mrf.mxu1  ;;  %3813 = vmatpush3.msra.mxu0 %v2883_v18 }
 0x175   : > { %v1235_v33 = vadd.f32 %v3546_v14, %v1234_v30  ;;  %v1562_v6 = vadd.f32 %v3594_v15, %v1561_v3  ;;  %3814 = vmatprep.subr.mxu0 %v4066_v11 }
 0x176   : > { %v1733_v7 = vpop.f32.mrf.mxu0  ;;  %v2060_v34 = vpop.f32.mrf.mxu1  ;;  %3815 = vmatpush3.msra.mxu0 %v2882_v19 }
 0x177   : > { %v1236_v35 = vadd.f32 %v3547_v23, %v1235_v33  ;;  %v1563_v8 = vadd.f32 %v3595_v24, %v1562_v6  ;;  %v2881_v24 = vld [vmem:[%s4553_s2 + $0x8] sm:$0xff]  ;;  %3816 = vmatprep.subr.mxu0 %v4066_v11 }
 0x178   : > { %v3615_v36 = vpop.f32.mrf.mxu0  ;;  %v3663_v37 = vpop.f32.mrf.mxu1  ;;  %3817 = vmatpush3.msra.mxu0 %v2881_v24 }
 0x179   : > { %v1237_v38 = vrot.slane %v1236_v35, 4  ;;  %v1564_v39 = vrot.slane %v1563_v8, 4  ;;  %3818 = vmatprep.subr.mxu0 %v4066_v11 }
 0x17a   : > { %v1736_v9 = vpop.f32.mrf.mxu0  ;;  %v2063_v40 = vpop.f32.mrf.mxu1  ;;  %3819 = vmatpush3.msra.mxu0 %v2880_v29 }
 0x17b   : > { %v1238_v41 = vadd.f32 %v1237_v38, %v1236_v35  ;;  %v1565_v42 = vadd.f32 %v1564_v39, %v1563_v8  ;;  %v1860_v43 = vadd.f32 %v1736_v9, %v1733_v7  ;;  %v2187_v44 = vadd.f32 %v2063_v40, %v2060_v34 }
 0x17c   : > { %v3618_v45 = vpop.f32.mrf.mxu0  ;;  %v3666_v46 = vpop.f32.mrf.mxu1 }
 0x17d   : > { %v1239_v47 = vrot.slane %v1238_v41, 2  ;;  %v1566_v48 = vrot.slane %v1565_v42, 2  ;;  %v1861_v49 = vadd.f32 %v3614_v31, %v1860_v43  ;;  %v2188_v50 = vadd.f32 %v3662_v32, %v2187_v44 }
 0x17e   : > { %v1749_v51 = vpop.f32.mrf.mxu0  ;;  %v2076_v52 = vpop.f32.mrf.mxu1 }
 0x17f   : > { %v1240_v53 = vadd.f32 %v1239_v47, %v1238_v41  ;;  %v1567_v54 = vadd.f32 %v1566_v48, %v1565_v42  ;;  %v1862_v55 = vadd.f32 %v3615_v36, %v1861_v49  ;;  %v2189_v56 = vadd.f32 %v3663_v37, %v2188_v50 }
 0x180   : > { %v3619_v58 = vpop.f32.mrf.mxu0  ;;  %v3667_v59 = vpop.f32.mrf.mxu1 }
 0x181   : > { %v1241_v60 = vrot.slane %v1240_v53, 1  ;;  %v1568_v61 = vrot.slane %v1567_v54, 1  ;;  %v1863_v62 = vadd.f32 %v1862_v55, %v1749_v51  ;;  %v2190_v63 = vadd.f32 %v2189_v56, %v2076_v52 }
 0x182   : > { %v1752_v2 = vpop.f32.mrf.mxu0  ;;  %v2079_v4 = vpop.f32.mrf.mxu1 }
 0x183   : > { %v1242_v0 = vadd.f32 %v1241_v60, %v1240_v53  ;;  %v1569_v5 = vadd.f32 %v1568_v61, %v1567_v54  ;;  %v1864_v10 = vadd.f32 %v1863_v62, %v1752_v2  ;;  %v2191_v12 = vadd.f32 %v2190_v63, %v2079_v4 }
 0x184   : > { %v3622_v14 = vpop.f32.mrf.mxu0  ;;  %v3670_v15 = vpop.f32.mrf.mxu1 }
 0x185   : > { %1243 = vst [vmem:[#allocation2 + $0x2] sm:$0x1] %v1242_v0  ;;  %1570 = vst [vmem:[#allocation2 + $0x3] sm:$0x1] %v1569_v5  ;;  %v1865_v16 = vadd.f32 %v3618_v45, %v1864_v10  ;;  %v2192_v17 = vadd.f32 %v3666_v46, %v2191_v12 }
 0x186   : > { %v1765_v20 = vpop.f32.mrf.mxu0  ;;  %v2092_v21 = vpop.f32.mrf.mxu1 }
 0x187   : > { %v1866_v22 = vadd.f32 %v3619_v58, %v1865_v16  ;;  %v2193_v23 = vadd.f32 %v3667_v59, %v2192_v17 }
 0x188   : > { %v3623_v25 = vpop.f32.mrf.mxu0  ;;  %v3671_v26 = vpop.f32.mrf.mxu1 }
 0x189   : > { %v1867_v27 = vadd.f32 %v1866_v22, %v1765_v20  ;;  %v2194_v28 = vadd.f32 %v2193_v23, %v2092_v21 }
 0x18a   : > { %v1768_v30 = vpop.f32.mrf.mxu0  ;;  %v2095_v3 = vpop.f32.mrf.mxu1 }
 0x18b   : > { %v1868_v31 = vadd.f32 %v1867_v27, %v1768_v30  ;;  %v2195_v32 = vadd.f32 %v2194_v28, %v2095_v3 }
 0x18c   : > { %v3626_v33 = vpop.f32.mrf.mxu0  ;;  %v3674_v6 = vpop.f32.mrf.mxu1 }
 0x18d   : > { %v1869_v7 = vadd.f32 %v3622_v14, %v1868_v31  ;;  %v2196_v34 = vadd.f32 %v3670_v15, %v2195_v32 }
 0x18e   : > { %v1781_v35 = vpop.f32.mrf.mxu0  ;;  %v2108_v8 = vpop.f32.mrf.mxu1 }
 0x18f   : > { %v1870_v36 = vadd.f32 %v3623_v25, %v1869_v7  ;;  %v2197_v37 = vadd.f32 %v3671_v26, %v2196_v34 }
 0x190   : > { %v3627_v38 = vpop.f32.mrf.mxu0  ;;  %v3675_v39 = vpop.f32.mrf.mxu1 }
 0x191   : > { %v1871_v9 = vadd.f32 %v1870_v36, %v1781_v35  ;;  %v2198_v40 = vadd.f32 %v2197_v37, %v2108_v8 }
 0x192   : > { %v1784_v41 = vpop.f32.mrf.mxu0  ;;  %v2111_v42 = vpop.f32.mrf.mxu1 }
 0x193   : > { %v1872_v43 = vadd.f32 %v1871_v9, %v1784_v41  ;;  %v2199_v44 = vadd.f32 %v2198_v40, %v2111_v42 }
 0x194   : > { %v3630_v45 = vpop.f32.mrf.mxu0  ;;  %v3678_v46 = vpop.f32.mrf.mxu1 }
 0x195   : > { %v1873_v11 = vadd.f32 %v3626_v33, %v1872_v43  ;;  %v2200_v47 = vadd.f32 %v3674_v6, %v2199_v44 }
 0x196   : > { %v1797_v48 = vpop.f32.mrf.mxu0  ;;  %v2124_v49 = vpop.f32.mrf.mxu1 }
 0x197   : > { %v1874_v50 = vadd.f32 %v3627_v38, %v1873_v11  ;;  %v2201_v51 = vadd.f32 %v3675_v39, %v2200_v47 }
 0x198   : > { %v3631_v52 = vpop.f32.mrf.mxu0  ;;  %v3679_v53 = vpop.f32.mrf.mxu1 }
 0x199   : > { %v1875_v54 = vadd.f32 %v1874_v50, %v1797_v48  ;;  %v2202_v55 = vadd.f32 %v2201_v51, %v2124_v49 }
 0x19a   : > { %v1800_v56 = vpop.f32.mrf.mxu0  ;;  %v2127_v57 = vpop.f32.mrf.mxu1 }
 0x19b   : > { %v1876_v58 = vadd.f32 %v1875_v54, %v1800_v56  ;;  %v2203_v59 = vadd.f32 %v2202_v55, %v2127_v57 }
 0x19c   : > { %v3634_v60 = vpop.f32.mrf.mxu0  ;;  %v3682_v61 = vpop.f32.mrf.mxu1 }
 0x19d   : > { %v1877_v62 = vadd.f32 %v3630_v45, %v1876_v58  ;;  %v2204_v63 = vadd.f32 %v3678_v46, %v2203_v59 }
 0x19e   : > { %v1813_v1 = vpop.f32.mrf.mxu0  ;;  %v2140_v2 = vpop.f32.mrf.mxu1 }
 0x19f   : > { %v1878_v4 = vadd.f32 %v3631_v52, %v1877_v62  ;;  %v2205_v0 = vadd.f32 %v3679_v53, %v2204_v63 }
 0x1a0   : > { %v3635_v5 = vpop.f32.mrf.mxu0  ;;  %v3683_v10 = vpop.f32.mrf.mxu1 }
 0x1a1   : > { %v1879_v12 = vadd.f32 %v1878_v4, %v1813_v1  ;;  %v2206_v13 = vadd.f32 %v2205_v0, %v2140_v2 }
 0x1a2   : > { %v1816_v14 = vpop.f32.mrf.mxu0  ;;  %v2143_v15 = vpop.f32.mrf.mxu1 }
 0x1a3   : > { %v1880_v16 = vadd.f32 %v1879_v12, %v1816_v14  ;;  %v2207_v17 = vadd.f32 %v2206_v13, %v2143_v15 }
 0x1a4   : > { %v3638_v18 = vpop.f32.mrf.mxu0  ;;  %v3686_v19 = vpop.f32.mrf.mxu1 }
 0x1a5   : > { %v1881_v20 = vadd.f32 %v3634_v60, %v1880_v16  ;;  %v2208_v21 = vadd.f32 %v3682_v61, %v2207_v17 }
 0x1a6   : > { %v1829_v22 = vpop.f32.mrf.mxu0  ;;  %v2156_v23 = vpop.f32.mrf.mxu1 }
 0x1a7   : > { %v1882_v24 = vadd.f32 %v3635_v5, %v1881_v20  ;;  %v2209_v25 = vadd.f32 %v3683_v10, %v2208_v21 }
 0x1a8   : > { %v3639_v26 = vpop.f32.mrf.mxu0  ;;  %v3687_v27 = vpop.f32.mrf.mxu1 }
 0x1a9   : > { %v1883_v28 = vadd.f32 %v1882_v24, %v1829_v22  ;;  %v2210_v29 = vadd.f32 %v2209_v25, %v2156_v23 }
 0x1aa   : > { %v1832_v30 = vpop.f32.mrf.mxu0  ;;  %v2159_v3 = vpop.f32.mrf.mxu1 }
 0x1ab   : > { %v1884_v31 = vadd.f32 %v1883_v28, %v1832_v30  ;;  %v2211_v32 = vadd.f32 %v2210_v29, %v2159_v3 }
 0x1ac   : > { %v3642_v33 = vpop.f32.mrf.mxu0  ;;  %v3690_v6 = vpop.f32.mrf.mxu1 }
 0x1ad   : > { %v1885_v7 = vadd.f32 %v3638_v18, %v1884_v31  ;;  %v2212_v34 = vadd.f32 %v3686_v19, %v2211_v32 }
 0x1ae   : > { %v1845_v35 = vpop.f32.mrf.mxu0  ;;  %v2172_v8 = vpop.f32.mrf.mxu1 }
 0x1af   : > { %v1886_v36 = vadd.f32 %v3639_v26, %v1885_v7  ;;  %v2213_v37 = vadd.f32 %v3687_v27, %v2212_v34 }
 0x1b0   : > { %v3643_v38 = vpop.f32.mrf.mxu0  ;;  %v3691_v39 = vpop.f32.mrf.mxu1 }
 0x1b1   : > { %v1887_v9 = vadd.f32 %v1886_v36, %v1845_v35  ;;  %v2214_v40 = vadd.f32 %v2213_v37, %v2172_v8 }
 0x1b2   : > { %v1848_v41 = vpop.f32.mrf.mxu0  ;;  %v2175_v42 = vpop.f32.mrf.mxu1 }
 0x1b3   : > { %v1888_v43 = vadd.f32 %v1887_v9, %v1848_v41  ;;  %v2215_v44 = vadd.f32 %v2214_v40, %v2175_v42 }
 0x1b4   : > { %v3710_v45 = vpop.f32.mrf.mxu0  ;;  %v3758_v46 = vpop.f32.mrf.mxu1 }
 0x1b5   : > { %v1889_v11 = vadd.f32 %v3642_v33, %v1888_v43  ;;  %v2216_v47 = vadd.f32 %v3690_v6, %v2215_v44 }
 0x1b6   : > { %v2387_v48 = vpop.f32.mrf.mxu0  ;;  %v2714_v49 = vpop.f32.mrf.mxu1 }
 0x1b7   : > { %v1890_v50 = vadd.f32 %v3643_v38, %v1889_v11  ;;  %v2217_v51 = vadd.f32 %v3691_v39, %v2216_v47 }
 0x1b8   : > { %v3711_v52 = vpop.f32.mrf.mxu0  ;;  %v3759_v53 = vpop.f32.mrf.mxu1 }
 0x1b9   : > { %v1891_v54 = vrot.slane %v1890_v50, 4  ;;  %v2218_v55 = vrot.slane %v2217_v51, 4 }
 0x1ba   : > { %v2390_v56 = vpop.f32.mrf.mxu0  ;;  %v2717_v57 = vpop.f32.mrf.mxu1 }
 0x1bb   : > { %v1892_v58 = vadd.f32 %v1891_v54, %v1890_v50  ;;  %v2219_v59 = vadd.f32 %v2218_v55, %v2217_v51  ;;  %v2514_v60 = vadd.f32 %v2390_v56, %v2387_v48  ;;  %v2841_v61 = vadd.f32 %v2717_v57, %v2714_v49 }
 0x1bc   : > { %v3714_v62 = vpop.f32.mrf.mxu0  ;;  %v3762_v63 = vpop.f32.mrf.mxu1 }
 0x1bd   : > { %v1893_v1 = vrot.slane %v1892_v58, 2  ;;  %v2220_v2 = vrot.slane %v2219_v59, 2  ;;  %v2515_v4 = vadd.f32 %v3710_v45, %v2514_v60  ;;  %v2842_v0 = vadd.f32 %v3758_v46, %v2841_v61 }
 0x1be   : > { %v2403_v5 = vpop.f32.mrf.mxu0  ;;  %v2730_v10 = vpop.f32.mrf.mxu1 }
 0x1bf   : > { %v1894_v12 = vadd.f32 %v1893_v1, %v1892_v58  ;;  %v2221_v13 = vadd.f32 %v2220_v2, %v2219_v59  ;;  %v2516_v14 = vadd.f32 %v3711_v52, %v2515_v4  ;;  %v2843_v15 = vadd.f32 %v3759_v53, %v2842_v0 }
 0x1c0   : > { %v3715_v16 = vpop.f32.mrf.mxu0  ;;  %v3763_v17 = vpop.f32.mrf.mxu1 }
 0x1c1   : > { %v1895_v18 = vrot.slane %v1894_v12, 1  ;;  %v2222_v19 = vrot.slane %v2221_v13, 1  ;;  %v2517_v20 = vadd.f32 %v2516_v14, %v2403_v5  ;;  %v2844_v21 = vadd.f32 %v2843_v15, %v2730_v10 }
 0x1c2   : > { %v2406_v22 = vpop.f32.mrf.mxu0  ;;  %v2733_v23 = vpop.f32.mrf.mxu1 }
 0x1c3   : > { %v1896_v24 = vadd.f32 %v1895_v18, %v1894_v12  ;;  %v2223_v25 = vadd.f32 %v2222_v19, %v2221_v13  ;;  %v2518_v26 = vadd.f32 %v2517_v20, %v2406_v22  ;;  %v2845_v27 = vadd.f32 %v2844_v21, %v2733_v23 }
 0x1c4   : > { %v3718_v28 = vpop.f32.mrf.mxu0  ;;  %v3766_v29 = vpop.f32.mrf.mxu1 }
 0x1c5   : > { %1897 = vst [vmem:[#allocation2 + $0x4] sm:$0x1] %v1896_v24  ;;  %2224 = vst [vmem:[#allocation2 + $0x5] sm:$0x1] %v2223_v25  ;;  %v2519_v30 = vadd.f32 %v3714_v62, %v2518_v26  ;;  %v2846_v3 = vadd.f32 %v3762_v63, %v2845_v27 }
 0x1c6   : > { %v2419_v31 = vpop.f32.mrf.mxu0  ;;  %v2746_v32 = vpop.f32.mrf.mxu1 }
 0x1c7   : > { %v2520_v33 = vadd.f32 %v3715_v16, %v2519_v30  ;;  %v2847_v6 = vadd.f32 %v3763_v17, %v2846_v3 }
 0x1c8   : > { %v3719_v7 = vpop.f32.mrf.mxu0  ;;  %v3767_v34 = vpop.f32.mrf.mxu1 }
 0x1c9   : > { %v2521_v35 = vadd.f32 %v2520_v33, %v2419_v31  ;;  %v2848_v8 = vadd.f32 %v2847_v6, %v2746_v32 }
 0x1ca   : > { %v2422_v36 = vpop.f32.mrf.mxu0  ;;  %v2749_v37 = vpop.f32.mrf.mxu1 }
 0x1cb   : > { %v2522_v38 = vadd.f32 %v2521_v35, %v2422_v36  ;;  %v2849_v39 = vadd.f32 %v2848_v8, %v2749_v37 }
 0x1cc   : > { %v3722_v9 = vpop.f32.mrf.mxu0  ;;  %v3770_v40 = vpop.f32.mrf.mxu1 }
 0x1cd   : > { %v2523_v41 = vadd.f32 %v3718_v28, %v2522_v38  ;;  %v2850_v42 = vadd.f32 %v3766_v29, %v2849_v39 }
 0x1ce   : > { %v2435_v43 = vpop.f32.mrf.mxu0  ;;  %v2762_v44 = vpop.f32.mrf.mxu1 }
 0x1cf   : > { %v2524_v45 = vadd.f32 %v3719_v7, %v2523_v41  ;;  %v2851_v46 = vadd.f32 %v3767_v34, %v2850_v42 }
 0x1d0   : > { %v3723_v11 = vpop.f32.mrf.mxu0  ;;  %v3771_v47 = vpop.f32.mrf.mxu1 }
 0x1d1   : > { %v2525_v48 = vadd.f32 %v2524_v45, %v2435_v43  ;;  %v2852_v49 = vadd.f32 %v2851_v46, %v2762_v44 }
 0x1d2   : > { %v2438_v50 = vpop.f32.mrf.mxu0  ;;  %v2765_v51 = vpop.f32.mrf.mxu1 }
 0x1d3   : > { %v2526_v52 = vadd.f32 %v2525_v48, %v2438_v50  ;;  %v2853_v53 = vadd.f32 %v2852_v49, %v2765_v51 }
 0x1d4   : > { %v3726_v54 = vpop.f32.mrf.mxu0  ;;  %v3774_v55 = vpop.f32.mrf.mxu1 }
 0x1d5   : > { %v2527_v56 = vadd.f32 %v3722_v9, %v2526_v52  ;;  %v2854_v57 = vadd.f32 %v3770_v40, %v2853_v53 }
 0x1d6   : > { %v2451_v58 = vpop.f32.mrf.mxu0  ;;  %v2778_v59 = vpop.f32.mrf.mxu1 }
 0x1d7   : > { %v2528_v60 = vadd.f32 %v3723_v11, %v2527_v56  ;;  %v2855_v61 = vadd.f32 %v3771_v47, %v2854_v57 }
 0x1d8   : > { %v3727_v62 = vpop.f32.mrf.mxu0  ;;  %v3775_v63 = vpop.f32.mrf.mxu1 }
 0x1d9   : > { %v2529_v1 = vadd.f32 %v2528_v60, %v2451_v58  ;;  %v2856_v2 = vadd.f32 %v2855_v61, %v2778_v59 }
 0x1da   : > { %v2454_v4 = vpop.f32.mrf.mxu0  ;;  %v2781_v0 = vpop.f32.mrf.mxu1 }
 0x1db   : > { %v2530_v5 = vadd.f32 %v2529_v1, %v2454_v4  ;;  %v2857_v10 = vadd.f32 %v2856_v2, %v2781_v0 }
 0x1dc   : > { %v3730_v12 = vpop.f32.mrf.mxu0  ;;  %v3778_v13 = vpop.f32.mrf.mxu1 }
 0x1dd   : > { %v2531_v14 = vadd.f32 %v3726_v54, %v2530_v5  ;;  %v2858_v15 = vadd.f32 %v3774_v55, %v2857_v10 }
 0x1de   : > { %v2467_v16 = vpop.f32.mrf.mxu0  ;;  %v2794_v17 = vpop.f32.mrf.mxu1 }
 0x1df   : > { %v2532_v18 = vadd.f32 %v3727_v62, %v2531_v14  ;;  %v2859_v19 = vadd.f32 %v3775_v63, %v2858_v15 }
 0x1e0   : > { %v3731_v20 = vpop.f32.mrf.mxu0  ;;  %v3779_v21 = vpop.f32.mrf.mxu1 }
 0x1e1   : > { %v2533_v22 = vadd.f32 %v2532_v18, %v2467_v16  ;;  %v2860_v23 = vadd.f32 %v2859_v19, %v2794_v17 }
 0x1e2   : > { %v2470_v24 = vpop.f32.mrf.mxu0  ;;  %v2797_v25 = vpop.f32.mrf.mxu1 }
 0x1e3   : > { %v2534_v26 = vadd.f32 %v2533_v22, %v2470_v24  ;;  %v2861_v27 = vadd.f32 %v2860_v23, %v2797_v25 }
 0x1e4   : > { %v3734_v28 = vpop.f32.mrf.mxu0  ;;  %v3782_v29 = vpop.f32.mrf.mxu1 }
 0x1e5   : > { %v2535_v30 = vadd.f32 %v3730_v12, %v2534_v26  ;;  %v2862_v3 = vadd.f32 %v3778_v13, %v2861_v27  ;;  %v3190_v13 = vld [vmem:[%s4554_s3] ss:$0 sm:$0xff] }
 0x1e6   : > { %v2483_v31 = vpop.f32.mrf.mxu0  ;;  %v2810_v32 = vpop.f32.mrf.mxu1 }
 0x1e7   : > { %v2536_v33 = vadd.f32 %v3731_v20, %v2535_v30  ;;  %v2863_v6 = vadd.f32 %v3779_v21, %v2862_v3 }
 0x1e8   : > { %v3735_v7 = vpop.f32.mrf.mxu0  ;;  %v3783_v34 = vpop.f32.mrf.mxu1 }
 0x1e9   : > { %v2537_v35 = vadd.f32 %v2536_v33, %v2483_v31  ;;  %v2864_v8 = vadd.f32 %v2863_v6, %v2810_v32 }
 0x1ea   : > { %v2486_v36 = vpop.f32.mrf.mxu0  ;;  %v2813_v37 = vpop.f32.mrf.mxu1 }
 0x1eb   : > { %v2538_v38 = vadd.f32 %v2537_v35, %v2486_v36  ;;  %v2865_v39 = vadd.f32 %v2864_v8, %v2813_v37 }
 0x1ec   : > { %v3738_v9 = vpop.f32.mrf.mxu0  ;;  %v3786_v40 = vpop.f32.mrf.mxu1 }
 0x1ed   : > { %v2539_v41 = vadd.f32 %v3734_v28, %v2538_v38  ;;  %v2866_v42 = vadd.f32 %v3782_v29, %v2865_v39 }
 0x1ee   : > { %v2499_v43 = vpop.f32.mrf.mxu0  ;;  %v2826_v44 = vpop.f32.mrf.mxu1 }
 0x1ef   : > { %v2540_v45 = vadd.f32 %v3735_v7, %v2539_v41  ;;  %v2867_v46 = vadd.f32 %v3783_v34, %v2866_v42 }
 0x1f0   : > { %v3739_v11 = vpop.f32.mrf.mxu0  ;;  %v3787_v47 = vpop.f32.mrf.mxu1 }
 0x1f1   : > { %v2541_v48 = vadd.f32 %v2540_v45, %v2499_v43  ;;  %v2868_v49 = vadd.f32 %v2867_v46, %v2826_v44 }
 0x1f2   : > { %v2502_v50 = vpop.f32.mrf.mxu0  ;;  %v2829_v51 = vpop.f32.mrf.mxu1 }
 0x1f3   : > { %v2542_v52 = vadd.f32 %v2541_v48, %v2502_v50  ;;  %v2869_v53 = vadd.f32 %v2868_v49, %v2829_v51 }
 0x1f5   : > { %v2543_v54 = vadd.f32 %v3738_v9, %v2542_v52  ;;  %v2870_v55 = vadd.f32 %v3786_v40, %v2869_v53 }
 0x1f7   : > { %v2544_v56 = vadd.f32 %v3739_v11, %v2543_v54  ;;  %v2871_v57 = vadd.f32 %v3787_v47, %v2870_v55 }
 0x1f9   : > { %v2545_v58 = vrot.slane %v2544_v56, 4  ;;  %v2872_v59 = vrot.slane %v2871_v57, 4 }
 0x1fb   : > { %v2546_v60 = vadd.f32 %v2545_v58, %v2544_v56  ;;  %v2873_v61 = vadd.f32 %v2872_v59, %v2871_v57 }
 0x1fd   : > { %v2547_v62 = vrot.slane %v2546_v60, 2  ;;  %v2874_v63 = vrot.slane %v2873_v61, 2 }
 0x1ff   : > { %v2548_v1 = vadd.f32 %v2547_v62, %v2546_v60  ;;  %v2875_v2 = vadd.f32 %v2874_v63, %v2873_v61 }
 0x201   : > { %v2549_v4 = vrot.slane %v2548_v1, 1  ;;  %v2876_v0 = vrot.slane %v2875_v2, 1 }
 0x203   : > { %v2550_v5 = vadd.f32 %v2549_v4, %v2548_v1  ;;  %v2877_v10 = vadd.f32 %v2876_v0, %v2875_v2 }
 0x205   : > { %2551 = vst [vmem:[#allocation2 + $0x6] sm:$0x1] %v2550_v5  ;;  %2878 = vst [vmem:[#allocation2 + $0x7] sm:$0x1] %v2877_v10 }
 0x20c   : > { %v2879_v12 = vld [vmem:[#allocation2] sm:$0xff] }
 0x20d   : > { %3821 = vmatmul.mubr.f32.vlgmr.msra.gmra.mxu0 %v2879_v12 }
 0x2cd   : > { %v2969_v14 = vpop.f32.mrf.mxu0 }
 0x2ce   : > { %v2970_v15 = vadd.f32 %v3190_v13, %v2969_v14 }
 0x2cf   : > { %v3822_v16 = vpop.f32.mrf.mxu0 }
 0x2d0   : > { %2973 = vst [vmem:[%s191_s22] sm:$0xff] %v2970_v15 }
 0x2d1   : > { %4017 = shalt.err (!%p4014_p3)
}
 0x2d2   : > { %s4018_s8 = scalar_lea.hbm %s4516_s29, 128  ;;  %s4022_s12 = scalar_lea.hbm %s4555_s4, 256 }
 0x2d3   : > { %p4019_p4 = scmp.ne.s32.totalorder %s4516_s29, %s4018_s8  ;;  %p4023_p9 = scmp.lt.s32.totalorder %s4516_s29, %s4555_s4 }
 0x2d4   : > { %p4024_p10 = scmp.lt.s32.totalorder %s4022_s12, %s4018_s8 }
 0x2d5   : > { %p4020_p7 = pnand %p4019_p4, %p4132_p5 }
 0x2d6   : > { %p4025_p11 = por %p4024_p10, %p4023_p9 }
 0x2d7   : > { %p4021_p8 = pneg %p4020_p7 }
 0x2d9   : > { %p4026_p12 = pnand %p4025_p11, %p4021_p8 }
 0x2db   : > { %4029 = shalt.err (!%p4026_p12)
}
 0x2dc   : > { %3823 = dma.vmem_to_hbm [thread:$0]  (%p4132_p5), %s2989_s23, 128, %s4516_s29, %s2975_s30  }
 0x2dd PF: > { %p3829_p13 = scmp.ge.s32.totalorder %s4064_s18, 2  ;;  %s3000_s14 = sand.u32 1, %s4052_s15  }
 0x2de   : > { %s3001_s20 = scalar_lea.sflag [#allocation4], %s3000_s14 }
 0x2df   : > { %p3826_p0 = pnand %p3829_p13, %p4136_p6 }
 0x2e1   : > { %p3827_p1 = pneg %p3826_p0 }
 0x2e3   : > { %4047 = dma.done.wait (%p3827_p1), %s3001_s20, 128  }
 0x2e4   : > { %4049 = vsyncadd (%p3827_p1), %s3001_s20, 4294967168  ;;  %p14_p2 = scmp.ge.s32.totalorder %s4119_s21, 4   ;;  %s4558_s15 = smov %s4056_s16 }
 0x2e5   : > { %s4559_s16 = smov %s4060_s17  ;;  %s4560_s17 = smov %s4130_s24 }
 0x2e6   : > { %s4561_s18 = smov %s4119_s21  ;;  %16 = sbr.rel (!%p14_p2) target bundleno = 3 (0x3), region = 71 }
 0x2eb   :  { %3006 = vsyncpa [#allocation4], 1 }
 0x2ec   :  { %3008 = vsyncpa [#allocation4 + $0x1], 1 }

</bundles_post_ra>
